<compile_context>
chip_gen: v7x
topology: tpu7x:2x2x1
jax: 0.10.0
libtpu: 0.0.40
codegen_flags: <defaults>
</compile_context>

<pallas_src>
import functools

import numpy as np

import jax
import jax.numpy as jnp
from jax import lax
from jax.experimental import pallas as pl
from jax.experimental.pallas import tpu as pltpu


# ----------------------- host-side constant builders ------------------------
# Flat "slab" layout: a conv over an HxW image (padded width W+2) produces a
# (C, H*(W+2)) slab; lane q <-> pixel (q // (W+2), q % (W+2)); lanes with
# q % (W+2) >= W are junk and every consumer below ignores them.

def _pool_gather_mat(H, W):
    """(Lm, (H/2+2)*(W/2+2)+2) gather: slab lane of window corner (0,0) of
    pooled pixel (hp,wp) -> zero-padded half-resolution buffer position."""
    Hp, Wp = H // 2, W // 2
    Lm = H * (W + 2) - (W + 3)
    Pn = (Hp + 2) * (Wp + 2) + 2
    G = np.zeros((Lm, Pn), np.float32)
    for hp in range(Hp):
        for wp in range(Wp):
            G[2 * hp * (W + 2) + 2 * wp, (hp + 1) * (Wp + 2) + (wp + 1)] = 1.0
    return G


def _unpool_scatter_mat(Hp, Wp):
    """(Hp*(Wp+2), (2Hp+2)*(2Wp+2)+2) scatter: pooled slab lane (hp,wp) ->
    window corner (0,0) position in the zero-padded full-resolution buffer."""
    H, W = 2 * Hp, 2 * Wp
    Lq = Hp * (Wp + 2)
    Pf = (H + 2) * (W + 2) + 2
    U = np.zeros((Lq, Pf), np.float32)
    for hp in range(Hp):
        for wp in range(Wp):
            U[hp * (Wp + 2) + wp, (2 * hp + 1) * (W + 2) + (2 * wp + 1)] = 1.0
    return U


def _valid_lane_mask(H, W):
    """(1, H*(W+2)) mask: 1 on valid slab lanes, 0 on junk lanes."""
    m = np.zeros((1, H * (W + 2)), np.float32)
    for h in range(H):
        m[0, h * (W + 2):h * (W + 2) + W] = 1.0
    return m


# ----------------------------- in-kernel helpers -----------------------------

def _conv3x3(xp, w, b, H, W, relu):
    """xp: (Cin, (H+2)*(W+2)+2) zero-padded flat activations.
    w: (Cout, 9*Cin) tap-major wide weights, b: (Cout, 1).
    One wide-K MXU dot per layer; returns the (Cout, H*(W+2)) conv slab."""
    Wp2 = W + 2
    L = H * Wp2
    taps = []
    for dy in range(3):
        for dx in range(3):
            off = dy * Wp2 + dx
            taps.append(xp[:, off:off + L])
    rhs = jnp.concatenate(taps, axis=0)                       # (9*Cin, L)
    out = jnp.dot(w, rhs, preferred_element_type=jnp.float32) + b
    return jnp.maximum(out, 0.0) if relu else out


def _maxpool2x2(slab, gmat, H, W):
    """MaxPool2d(2, return_indices=True) followed by ReLU (PyTorch order).
    Window max/argmax via 3 static lane-shifted compares (VPU), then ONE
    gather dot that simultaneously re-zero-pads for the next conv."""
    C = slab.shape[0]
    Wp2 = W + 2
    Lm = H * Wp2 - (Wp2 + 1)
    x00 = slab[:, 0:Lm]
    x01 = slab[:, 1:1 + Lm]
    x10 = slab[:, Wp2:Wp2 + Lm]
    x11 = slab[:, Wp2 + 1:Wp2 + 1 + Lm]
    m = jnp.maximum(jnp.maximum(x00, x01), jnp.maximum(x10, x11))
    idx = jnp.full(m.shape, 3.0, jnp.float32)
    idx = jnp.where(x10 == m, 2.0, idx)
    idx = jnp.where(x01 == m, 1.0, idx)
    idx = jnp.where(x00 == m, 0.0, idx)        # first-occurrence tie-break
    g = jnp.dot(jnp.concatenate([m, idx], axis=0), gmat,
                preferred_element_type=jnp.float32)
    return jnp.maximum(g[:C], 0.0), g[C:]      # (relu'd pooled pad, idx pad)


def _maxunpool2x2(slab, idx_pad, umat, Hp, Wp):
    """MaxUnpool2d(2) followed by ReLU.  ONE scatter dot to the window's
    (0,0) corner, then 3 static lane shifts + compare/select distribute each
    value to its recorded corner.  Output is the zero-padded full-res buffer."""
    C = slab.shape[0]
    Lq = Hp * (Wp + 2)
    W = 2 * Wp
    idx_slab = idx_pad[:, Wp + 3:Wp + 3 + Lq]
    scat = jnp.dot(jnp.concatenate([slab, idx_slab], axis=0), umat,
                   preferred_element_type=jnp.float32)
    vs, ix = scat[:C], scat[C:]
    P = vs.shape[1]
    out = jnp.where(ix == 0.0, vs, 0.0)
    for code, off in ((1.0, 1), (2.0, W + 2), (3.0, W + 3)):
        sel = jnp.where(ix == code, vs, 0.0)
        out = out + jnp.concatenate(
            [jnp.zeros((C, off), jnp.float32), sel[:, :P - off]], axis=-1)
    return jnp.maximum(out, 0.0)


def _place_padded(slab, lane_mask, W):
    """Embed a conv slab (C, H*(W+2)) as the interior of a zero-padded
    (C, (H+2)*(W+2)+2) buffer: mask junk lanes, shift by W+3."""
    C, L = slab.shape
    shift = W + 3
    z = jnp.zeros((C, shift), jnp.float32)
    return jnp.concatenate([z, slab * lane_mask, z], axis=-1)


# ------------------------------- fused kernel --------------------------------

def _ae_kernel(x_ref,
               w1_ref, w2_ref, w3_ref, w4_ref, w5_ref, w6_ref,
               b1_ref, b2_ref, b3_ref, b4_ref, b5_ref, b6_ref,
               g1_ref, g2_ref, u2_ref, u1_ref, m3_ref,
               dec_ref, enc_ref, *, H, W):
    H2, W2, H3, W3 = H // 2, W // 2, H // 4, W // 4
    x = x_ref[0]                                  # (3, (H+2)*(W+2)+2)

    # -------- encoder --------
    h1 = _conv3x3(x, w1_ref[...], b1_ref[...], H, W, relu=False)
    p1, idx1 = _maxpool2x2(h1, g1_ref[...], H, W)              # pool -> relu
    # TODO(synk): Dropout2d(p=0.25) treated as identity (inference mode).
    h2 = _conv3x3(p1, w2_ref[...], b2_ref[...], H2, W2, relu=False)
    p2, idx2 = _maxpool2x2(h2, g2_ref[...], H2, W2)
    enc = _conv3x3(p2, w3_ref[...], b3_ref[...], H3, W3, relu=True)
    enc_ref[0] = enc

    # -------- decoder --------
    enc_pad = _place_padded(enc, m3_ref[...], W3)
    d1 = _conv3x3(enc_pad, w4_ref[...], b4_ref[...], H3, W3, relu=False)
    d1u = _maxunpool2x2(d1, idx2, u2_ref[...], H3, W3)         # unpool -> relu
    d2 = _conv3x3(d1u, w5_ref[...], b5_ref[...], H2, W2, relu=False)
    d2u = _maxunpool2x2(d2, idx1, u1_ref[...], H2, W2)
    d3 = _conv3x3(d2u, w6_ref[...], b6_ref[...], H, W, relu=False)
    dec_ref[0] = d3


# ---------------------------- host-side wrappers -----------------------------

def _deconv_to_conv_weight(w_t):
    """ConvTranspose2d weight (Cin, Cout, 3, 3), stride=1, pad=1 -> equivalent
    Conv2d weight (Cout, Cin, 3, 3): flip spatially, swap channel axes."""
    return jnp.transpose(jnp.flip(w_t, axis=(2, 3)), (1, 0, 2, 3))


def _wide_tap_weight(w_oihw):
    """(Cout, Cin, 3, 3) -> (Cout, 9*Cin), column index = (dy*3+dx)*Cin + ci,
    matching the tap-major stacked RHS built inside the kernel."""
    ci = w_oihw.shape[1]
    return jnp.transpose(w_oihw, (2, 3, 1, 0)).reshape(9 * ci, -1).T


def autoencoder_forward(params, x_nchw):
    """Matches Autoencoder.forward: returns (decoded, encoded), both NCHW."""
    N, Cin, H, W = x_nchw.shape
    assert Cin == 3 and H % 4 == 0 and W % 4 == 0
    H2, W2, H3, W3 = H // 2, W // 2, H // 4, W // 4
    P1 = (H + 2) * (W + 2) + 2

    # One-time, tiny host-side weight/constant preparation.
    w1 = _wide_tap_weight(params["conv1_w"])
    w2 = _wide_tap_weight(params["conv2_w"])
    w3 = _wide_tap_weight(params["conv3_w"])
    w4 = _wide_tap_weight(_deconv_to_conv_weight(params["deconv1_w"]))
    w5 = _wide_tap_weight(_deconv_to_conv_weight(params["deconv2_w"]))
    w6 = _wide_tap_weight(_deconv_to_conv_weight(params["deconv3_w"]))
    b1 = params["conv1_b"].reshape(-1, 1)
    b2 = params["conv2_b"].reshape(-1, 1)
    b3 = params["conv3_b"].reshape(-1, 1)
    b4 = params["deconv1_b"].reshape(-1, 1)
    b5 = params["deconv2_b"].reshape(-1, 1)
    b6 = params["deconv3_b"].reshape(-1, 1)

    g1 = jnp.asarray(_pool_gather_mat(H, W))
    g2 = jnp.asarray(_pool_gather_mat(H2, W2))
    u2 = jnp.asarray(_unpool_scatter_mat(H3, W3))
    u1 = jnp.asarray(_unpool_scatter_mat(H2, W2))
    m3 = jnp.asarray(_valid_lane_mask(H3, W3))
    # TODO(synk): for large H,W replace the remaining gather/scatter matrices
    # (still O((H*W)^2/4) each) with lane-strided gathers and re-derive the
    # VMEM budget (v7x has 64 MiB physical VMEM).

    # Zero-padded, row-flattened input with 2 spare lanes: (N, 3, P1).
    xpad = jnp.pad(x_nchw.astype(jnp.float32), ((0, 0), (0, 0), (1, 1), (1, 1)))
    xpad = xpad.reshape(N, Cin, (H + 2) * (W + 2))
    xpad = jnp.pad(xpad, ((0, 0), (0, 0), (0, 2)))

    in_args = [w1, w2, w3, w4, w5, w6, b1, b2, b3, b4, b5, b6,
               g1, g2, u2, u1, m3]
    full2d = lambda a: pl.BlockSpec(a.shape, lambda i: (0, 0))
    in_specs = ([pl.BlockSpec((1, Cin, P1), lambda i: (i, 0, 0))]
                + [full2d(a) for a in in_args])
    out_specs = (pl.BlockSpec((1, 3, H * (W + 2)), lambda i: (i, 0, 0)),
                 pl.BlockSpec((1, 16, H3 * (W3 + 2)), lambda i: (i, 0, 0)))

    dec_slab, enc_slab = pl.pallas_call(
        functools.partial(_ae_kernel, H=H, W=W),
        out_shape=(jax.ShapeDtypeStruct((N, 3, H * (W + 2)), jnp.float32),
                   jax.ShapeDtypeStruct((N, 16, H3 * (W3 + 2)), jnp.float32)),
        grid=(N,),                              # one image per step; v7x: 2 TCs
        in_specs=in_specs,
        out_specs=out_specs,
        compiler_params=pltpu.CompilerParams(
            dimension_semantics=("parallel",)),
    )(xpad, *in_args)

    decoded = dec_slab.reshape(N, 3, H, W + 2)[..., :W]
    encoded = enc_slab.reshape(N, 16, H3, W3 + 2)[..., :W3]
    return decoded, encoded


def init_params(key):
    ks = jax.random.split(key, 12)

    def w(k, shape):
        return jax.random.normal(k, shape, jnp.float32) * 0.1

    return {
        "conv1_w": w(ks[0], (8, 3, 3, 3)),     "conv1_b": w(ks[1], (8,)),
        "conv2_w": w(ks[2], (12, 8, 3, 3)),    "conv2_b": w(ks[3], (12,)),
        "conv3_w": w(ks[4], (16, 12, 3, 3)),   "conv3_b": w(ks[5], (16,)),
        "deconv1_w": w(ks[6], (16, 12, 3, 3)), "deconv1_b": w(ks[7], (12,)),
        "deconv2_w": w(ks[8], (12, 8, 3, 3)),  "deconv2_b": w(ks[9], (8,)),
        "deconv3_w": w(ks[10], (8, 3, 3, 3)),  "deconv3_b": w(ks[11], (3,)),
    }


# ---------------------------- pure-JAX reference -----------------------------

def _conv_ref(x, w, b):
    y = lax.conv_general_dilated(
        x, w, window_strides=(1, 1), padding=((1, 1), (1, 1)),
        dimension_numbers=("NCHW", "OIHW", "NCHW"),
        precision=lax.Precision.HIGHEST)
    return y + b.reshape(1, -1, 1, 1)


def _pool_ref(x):
    N, C, H, W = x.shape
    xw = x.reshape(N, C, H // 2, 2, W // 2, 2)
    xw = jnp.transpose(xw, (0, 1, 2, 4, 3, 5)).reshape(N, C, H // 2, W // 2, 4)
    return jnp.max(xw, axis=-1), jnp.argmax(xw, axis=-1)


def _unpool_ref(x, idx):
    N, C, Hp, Wp = x.shape
    y = x[..., None] * jax.nn.one_hot(idx, 4, dtype=x.dtype)
    y = y.reshape(N, C, Hp, Wp, 2, 2)
    return jnp.transpose(y, (0, 1, 2, 4, 3, 5)).reshape(N, C, 2 * Hp, 2 * Wp)


def autoencoder_reference(params, x):
    e = _conv_ref(x, params["conv1_w"], params["conv1_b"])
    e, i1 = _pool_ref(e)
    e = jax.nn.relu(e)
    e = _conv_ref(e, params["conv2_w"], params["conv2_b"])
    e, i2 = _pool_ref(e)
    e = jax.nn.relu(e)
    e = jax.nn.relu(_conv_ref(e, params["conv3_w"], params["conv3_b"]))
    d = _conv_ref(e, _deconv_to_conv_weight(params["deconv1_w"]),
                  params["deconv1_b"])
    d = jax.nn.relu(_unpool_ref(d, i2))
    d = _conv_ref(d, _deconv_to_conv_weight(params["deconv2_w"]),
                  params["deconv2_b"])
    d = jax.nn.relu(_unpool_ref(d, i1))
    d = _conv_ref(d, _deconv_to_conv_weight(params["deconv3_w"]),
                  params["deconv3_b"])
    return d, e


# --------------------------------- main --------------------------------------

if __name__ == "__main__":
    key = jax.random.PRNGKey(0)
    kx, kp = jax.random.split(key)
    x = jax.random.normal(kx, (2, 3, 16, 16), jnp.float32)   # NCHW, like PyTorch
    params = init_params(kp)

    decoded, encoded = jax.jit(autoencoder_forward)(params, x)
    jax.block_until_ready((decoded, encoded))

    assert decoded.shape == (2, 3, 16, 16), decoded.shape
    assert encoded.shape == (2, 16, 4, 4), encoded.shape
    assert bool(jnp.isfinite(decoded).all()) and bool(jnp.isfinite(encoded).all())

    dec_r, enc_r = autoencoder_reference(params, x)
    enc_err = float(jnp.max(jnp.abs(encoded - enc_r)))
    assert enc_err < 1e-3, enc_err
    # Decoder depends on pool argmax; a rare near-tie resolved differently by
    # MXU vs XLA-conv rounding moves one unpool target, so require 99%
    # elementwise agreement instead of strict allclose.
    close = jnp.abs(decoded - dec_r) <= (1e-3 + 1e-3 * jnp.abs(dec_r))
    frac = float(jnp.mean(close.astype(jnp.float32)))
    assert frac > 0.99, frac

    print("KERNEL_OK")
</pallas_src>

<mosaic_0001>
module attributes {stable_mosaic.version = 11 : i64} {
  func.func @_ae_kernel(%arg0: i32, %arg1: memref<1x3x326xf32, #tpu.memory_space<vmem>>, %arg2: memref<8x27xf32, #tpu.memory_space<vmem>>, %arg3: memref<12x72xf32, #tpu.memory_space<vmem>>, %arg4: memref<16x108xf32, #tpu.memory_space<vmem>>, %arg5: memref<12x144xf32, #tpu.memory_space<vmem>>, %arg6: memref<8x108xf32, #tpu.memory_space<vmem>>, %arg7: memref<3x72xf32, #tpu.memory_space<vmem>>, %arg8: memref<8x1xf32, #tpu.memory_space<vmem>>, %arg9: memref<12x1xf32, #tpu.memory_space<vmem>>, %arg10: memref<16x1xf32, #tpu.memory_space<vmem>>, %arg11: memref<12x1xf32, #tpu.memory_space<vmem>>, %arg12: memref<8x1xf32, #tpu.memory_space<vmem>>, %arg13: memref<3x1xf32, #tpu.memory_space<vmem>>, %arg14: memref<269x102xf32, #tpu.memory_space<vmem>>, %arg15: memref<69x38xf32, #tpu.memory_space<vmem>>, %arg16: memref<24x102xf32, #tpu.memory_space<vmem>>, %arg17: memref<80x326xf32, #tpu.memory_space<vmem>>, %arg18: memref<1x24xf32, #tpu.memory_space<vmem>>, %arg19: memref<1x3x288xf32, #tpu.memory_space<vmem>>, %arg20: memref<1x16x24xf32, #tpu.memory_space<vmem>>) attributes {dimension_semantics = [#tpu.dimension_semantics<parallel>], iteration_bounds = array<i64: 2>, scalar_prefetch = 0 : i64, scratch_operands = 0 : i64, tpu.core_type = #tpu.core_type<tc>, window_params = [{transform_indices = @transform_0, window_bounds = array<i64: 1, 3, 326>}, {pipeline_mode = #tpu.pipeline_mode<synchronous>, transform_indices = @transform_1, window_bounds = array<i64: 8, 27>}, {pipeline_mode = #tpu.pipeline_mode<synchronous>, transform_indices = @transform_2, window_bounds = array<i64: 12, 72>}, {pipeline_mode = #tpu.pipeline_mode<synchronous>, transform_indices = @transform_3, window_bounds = array<i64: 16, 108>}, {pipeline_mode = #tpu.pipeline_mode<synchronous>, transform_indices = @transform_4, window_bounds = array<i64: 12, 144>}, {pipeline_mode = #tpu.pipeline_mode<synchronous>, transform_indices = @transform_5, window_bounds = array<i64: 8, 108>}, {pipeline_mode = #tpu.pipeline_mode<synchronous>, transform_indices = @transform_6, window_bounds = array<i64: 3, 72>}, {pipeline_mode = #tpu.pipeline_mode<synchronous>, transform_indices = @transform_7, window_bounds = array<i64: 8, 1>}, {pipeline_mode = #tpu.pipeline_mode<synchronous>, transform_indices = @transform_8, window_bounds = array<i64: 12, 1>}, {pipeline_mode = #tpu.pipeline_mode<synchronous>, transform_indices = @transform_9, window_bounds = array<i64: 16, 1>}, {pipeline_mode = #tpu.pipeline_mode<synchronous>, transform_indices = @transform_10, window_bounds = array<i64: 12, 1>}, {pipeline_mode = #tpu.pipeline_mode<synchronous>, transform_indices = @transform_11, window_bounds = array<i64: 8, 1>}, {pipeline_mode = #tpu.pipeline_mode<synchronous>, transform_indices = @transform_12, window_bounds = array<i64: 3, 1>}, {pipeline_mode = #tpu.pipeline_mode<synchronous>, transform_indices = @transform_13, window_bounds = array<i64: 269, 102>}, {pipeline_mode = #tpu.pipeline_mode<synchronous>, transform_indices = @transform_14, window_bounds = array<i64: 69, 38>}, {pipeline_mode = #tpu.pipeline_mode<synchronous>, transform_indices = @transform_15, window_bounds = array<i64: 24, 102>}, {pipeline_mode = #tpu.pipeline_mode<synchronous>, transform_indices = @transform_16, window_bounds = array<i64: 80, 326>}, {pipeline_mode = #tpu.pipeline_mode<synchronous>, transform_indices = @transform_17, window_bounds = array<i64: 1, 24>}, {transform_indices = @transform_18, window_bounds = array<i64: 1, 3, 288>}, {transform_indices = @transform_19, window_bounds = array<i64: 1, 16, 24>}]} {
    %c0 = arith.constant 0 : index
    %c0_0 = arith.constant 0 : index
    %c0_1 = arith.constant 0 : index
    %0 = vector.load %arg1[%c0, %c0_0, %c0_1] : memref<1x3x326xf32, #tpu.memory_space<vmem>>, vector<1x3x326xf32>
    %1 = vector.shape_cast %0 : vector<1x3x326xf32> to vector<3x326xf32>
    %c0_2 = arith.constant 0 : index
    %c0_3 = arith.constant 0 : index
    %2 = vector.load %arg2[%c0_2, %c0_3] : memref<8x27xf32, #tpu.memory_space<vmem>>, vector<8x27xf32>
    %c0_4 = arith.constant 0 : index
    %c0_5 = arith.constant 0 : index
    %3 = vector.load %arg8[%c0_4, %c0_5] : memref<8x1xf32, #tpu.memory_space<vmem>>, vector<8x1xf32>
    %4 = vector.extract_strided_slice %1 {offsets = [0, 0], sizes = [3, 288], strides = [1, 1]} : vector<3x326xf32> to vector<3x288xf32>
    %5 = vector.extract_strided_slice %1 {offsets = [0, 1], sizes = [3, 288], strides = [1, 1]} : vector<3x326xf32> to vector<3x288xf32>
    %6 = vector.extract_strided_slice %1 {offsets = [0, 2], sizes = [3, 288], strides = [1, 1]} : vector<3x326xf32> to vector<3x288xf32>
    %7 = vector.extract_strided_slice %1 {offsets = [0, 18], sizes = [3, 288], strides = [1, 1]} : vector<3x326xf32> to vector<3x288xf32>
    %8 = vector.extract_strided_slice %1 {offsets = [0, 19], sizes = [3, 288], strides = [1, 1]} : vector<3x326xf32> to vector<3x288xf32>
    %9 = vector.extract_strided_slice %1 {offsets = [0, 20], sizes = [3, 288], strides = [1, 1]} : vector<3x326xf32> to vector<3x288xf32>
    %10 = vector.extract_strided_slice %1 {offsets = [0, 36], sizes = [3, 288], strides = [1, 1]} : vector<3x326xf32> to vector<3x288xf32>
    %11 = vector.extract_strided_slice %1 {offsets = [0, 37], sizes = [3, 288], strides = [1, 1]} : vector<3x326xf32> to vector<3x288xf32>
    %12 = vector.extract_strided_slice %1 {offsets = [0, 38], sizes = [3, 288], strides = [1, 1]} : vector<3x326xf32> to vector<3x288xf32>
    %13 = tpu.concatenate %4, %5, %6, %7, %8, %9, %10, %11, %12 in 0 : vector<3x288xf32>, vector<3x288xf32>, vector<3x288xf32>, vector<3x288xf32>, vector<3x288xf32>, vector<3x288xf32>, vector<3x288xf32>, vector<3x288xf32>, vector<3x288xf32> -> vector<27x288xf32>
    %cst = arith.constant dense<0.000000e+00> : vector<8x288xf32>
    %14 = tpu.matmul %2, %13, %cst {dimension_numbers = #tpu.dot_dimension_numbers<[1], [0], [0], [1], [0, 0, 1, 1], [], []>} : vector<8x27xf32>, vector<27x288xf32>, vector<8x288xf32> -> vector<8x288xf32>
    %15 = vector.broadcast %3 : vector<8x1xf32> to vector<8x288xf32>
    %16 = arith.addf %14, %15 : vector<8x288xf32>
    %c0_6 = arith.constant 0 : index
    %c0_7 = arith.constant 0 : index
    %17 = vector.load %arg14[%c0_6, %c0_7] : memref<269x102xf32, #tpu.memory_space<vmem>>, vector<269x102xf32>
    %18 = vector.extract_strided_slice %16 {offsets = [0, 0], sizes = [8, 269], strides = [1, 1]} : vector<8x288xf32> to vector<8x269xf32>
    %19 = vector.extract_strided_slice %16 {offsets = [0, 1], sizes = [8, 269], strides = [1, 1]} : vector<8x288xf32> to vector<8x269xf32>
    %20 = vector.extract_strided_slice %16 {offsets = [0, 18], sizes = [8, 269], strides = [1, 1]} : vector<8x288xf32> to vector<8x269xf32>
    %21 = vector.extract_strided_slice %16 {offsets = [0, 19], sizes = [8, 269], strides = [1, 1]} : vector<8x288xf32> to vector<8x269xf32>
    %22 = arith.maximumf %18, %19 : vector<8x269xf32>
    %23 = arith.maximumf %20, %21 : vector<8x269xf32>
    %24 = arith.maximumf %22, %23 : vector<8x269xf32>
    %cst_8 = arith.constant 3.000000e+00 : f32
    %25 = vector.broadcast %cst_8 : f32 to vector<8x269xf32>
    %26 = arith.cmpf oeq, %20, %24 : vector<8x269xf32>
    %cst_9 = arith.constant 2.000000e+00 : f32
    %27 = vector.broadcast %cst_9 : f32 to vector<8x269xf32>
    %28 = arith.select %26, %27, %25 : vector<8x269xi1>, vector<8x269xf32>
    %29 = arith.cmpf oeq, %19, %24 : vector<8x269xf32>
    %cst_10 = arith.constant 1.000000e+00 : f32
    %30 = vector.broadcast %cst_10 : f32 to vector<8x269xf32>
    %31 = arith.select %29, %30, %28 : vector<8x269xi1>, vector<8x269xf32>
    %32 = arith.cmpf oeq, %18, %24 : vector<8x269xf32>
    %cst_11 = arith.constant 0.000000e+00 : f32
    %33 = vector.broadcast %cst_11 : f32 to vector<8x269xf32>
    %34 = arith.select %32, %33, %31 : vector<8x269xi1>, vector<8x269xf32>
    %35 = tpu.concatenate %24, %34 in 0 : vector<8x269xf32>, vector<8x269xf32> -> vector<16x269xf32>
    %cst_12 = arith.constant dense<0.000000e+00> : vector<16x102xf32>
    %36 = tpu.matmul %35, %17, %cst_12 {dimension_numbers = #tpu.dot_dimension_numbers<[1], [0], [0], [1], [0, 0, 1, 1], [], []>} : vector<16x269xf32>, vector<269x102xf32>, vector<16x102xf32> -> vector<16x102xf32>
    %37 = vector.extract_strided_slice %36 {offsets = [0, 0], sizes = [8, 102], strides = [1, 1]} : vector<16x102xf32> to vector<8x102xf32>
    %cst_13 = arith.constant 0.000000e+00 : f32
    %38 = vector.broadcast %cst_13 : f32 to vector<8x102xf32>
    %39 = arith.maximumf %37, %38 : vector<8x102xf32>
    %40 = vector.extract_strided_slice %36 {offsets = [8, 0], sizes = [8, 102], strides = [1, 1]} : vector<16x102xf32> to vector<8x102xf32>
    %c0_14 = arith.constant 0 : index
    %c0_15 = arith.constant 0 : index
    %41 = vector.load %arg3[%c0_14, %c0_15] : memref<12x72xf32, #tpu.memory_space<vmem>>, vector<12x72xf32>
    %c0_16 = arith.constant 0 : index
    %c0_17 = arith.constant 0 : index
    %42 = vector.load %arg9[%c0_16, %c0_17] : memref<12x1xf32, #tpu.memory_space<vmem>>, vector<12x1xf32>
    %43 = vector.extract_strided_slice %39 {offsets = [0, 0], sizes = [8, 80], strides = [1, 1]} : vector<8x102xf32> to vector<8x80xf32>
    %44 = vector.extract_strided_slice %39 {offsets = [0, 1], sizes = [8, 80], strides = [1, 1]} : vector<8x102xf32> to vector<8x80xf32>
    %45 = vector.extract_strided_slice %39 {offsets = [0, 2], sizes = [8, 80], strides = [1, 1]} : vector<8x102xf32> to vector<8x80xf32>
    %46 = vector.extract_strided_slice %39 {offsets = [0, 10], sizes = [8, 80], strides = [1, 1]} : vector<8x102xf32> to vector<8x80xf32>
    %47 = vector.extract_strided_slice %39 {offsets = [0, 11], sizes = [8, 80], strides = [1, 1]} : vector<8x102xf32> to vector<8x80xf32>
    %48 = vector.extract_strided_slice %39 {offsets = [0, 12], sizes = [8, 80], strides = [1, 1]} : vector<8x102xf32> to vector<8x80xf32>
    %49 = vector.extract_strided_slice %39 {offsets = [0, 20], sizes = [8, 80], strides = [1, 1]} : vector<8x102xf32> to vector<8x80xf32>
    %50 = vector.extract_strided_slice %39 {offsets = [0, 21], sizes = [8, 80], strides = [1, 1]} : vector<8x102xf32> to vector<8x80xf32>
    %51 = vector.extract_strided_slice %39 {offsets = [0, 22], sizes = [8, 80], strides = [1, 1]} : vector<8x102xf32> to vector<8x80xf32>
    %52 = tpu.concatenate %43, %44, %45, %46, %47, %48, %49, %50, %51 in 0 : vector<8x80xf32>, vector<8x80xf32>, vector<8x80xf32>, vector<8x80xf32>, vector<8x80xf32>, vector<8x80xf32>, vector<8x80xf32>, vector<8x80xf32>, vector<8x80xf32> -> vector<72x80xf32>
    %cst_18 = arith.constant dense<0.000000e+00> : vector<12x80xf32>
    %53 = tpu.matmul %41, %52, %cst_18 {dimension_numbers = #tpu.dot_dimension_numbers<[1], [0], [0], [1], [0, 0, 1, 1], [], []>} : vector<12x72xf32>, vector<72x80xf32>, vector<12x80xf32> -> vector<12x80xf32>
    %54 = vector.broadcast %42 : vector<12x1xf32> to vector<12x80xf32>
    %55 = arith.addf %53, %54 : vector<12x80xf32>
    %c0_19 = arith.constant 0 : index
    %c0_20 = arith.constant 0 : index
    %56 = vector.load %arg15[%c0_19, %c0_20] : memref<69x38xf32, #tpu.memory_space<vmem>>, vector<69x38xf32>
    %57 = vector.extract_strided_slice %55 {offsets = [0, 0], sizes = [12, 69], strides = [1, 1]} : vector<12x80xf32> to vector<12x69xf32>
    %58 = vector.extract_strided_slice %55 {offsets = [0, 1], sizes = [12, 69], strides = [1, 1]} : vector<12x80xf32> to vector<12x69xf32>
    %59 = vector.extract_strided_slice %55 {offsets = [0, 10], sizes = [12, 69], strides = [1, 1]} : vector<12x80xf32> to vector<12x69xf32>
    %60 = vector.extract_strided_slice %55 {offsets = [0, 11], sizes = [12, 69], strides = [1, 1]} : vector<12x80xf32> to vector<12x69xf32>
    %61 = arith.maximumf %57, %58 : vector<12x69xf32>
    %62 = arith.maximumf %59, %60 : vector<12x69xf32>
    %63 = arith.maximumf %61, %62 : vector<12x69xf32>
    %cst_21 = arith.constant 3.000000e+00 : f32
    %64 = vector.broadcast %cst_21 : f32 to vector<12x69xf32>
    %65 = arith.cmpf oeq, %59, %63 : vector<12x69xf32>
    %cst_22 = arith.constant 2.000000e+00 : f32
    %66 = vector.broadcast %cst_22 : f32 to vector<12x69xf32>
    %67 = arith.select %65, %66, %64 : vector<12x69xi1>, vector<12x69xf32>
    %68 = arith.cmpf oeq, %58, %63 : vector<12x69xf32>
    %cst_23 = arith.constant 1.000000e+00 : f32
    %69 = vector.broadcast %cst_23 : f32 to vector<12x69xf32>
    %70 = arith.select %68, %69, %67 : vector<12x69xi1>, vector<12x69xf32>
    %71 = arith.cmpf oeq, %57, %63 : vector<12x69xf32>
    %cst_24 = arith.constant 0.000000e+00 : f32
    %72 = vector.broadcast %cst_24 : f32 to vector<12x69xf32>
    %73 = arith.select %71, %72, %70 : vector<12x69xi1>, vector<12x69xf32>
    %74 = tpu.concatenate %63, %73 in 0 : vector<12x69xf32>, vector<12x69xf32> -> vector<24x69xf32>
    %cst_25 = arith.constant dense<0.000000e+00> : vector<24x38xf32>
    %75 = tpu.matmul %74, %56, %cst_25 {dimension_numbers = #tpu.dot_dimension_numbers<[1], [0], [0], [1], [0, 0, 1, 1], [], []>} : vector<24x69xf32>, vector<69x38xf32>, vector<24x38xf32> -> vector<24x38xf32>
    %76 = vector.extract_strided_slice %75 {offsets = [0, 0], sizes = [12, 38], strides = [1, 1]} : vector<24x38xf32> to vector<12x38xf32>
    %cst_26 = arith.constant 0.000000e+00 : f32
    %77 = vector.broadcast %cst_26 : f32 to vector<12x38xf32>
    %78 = arith.maximumf %76, %77 : vector<12x38xf32>
    %79 = vector.extract_strided_slice %75 {offsets = [12, 0], sizes = [12, 38], strides = [1, 1]} : vector<24x38xf32> to vector<12x38xf32>
    %c0_27 = arith.constant 0 : index
    %c0_28 = arith.constant 0 : index
    %80 = vector.load %arg4[%c0_27, %c0_28] : memref<16x108xf32, #tpu.memory_space<vmem>>, vector<16x108xf32>
    %c0_29 = arith.constant 0 : index
    %c0_30 = arith.constant 0 : index
    %81 = vector.load %arg10[%c0_29, %c0_30] : memref<16x1xf32, #tpu.memory_space<vmem>>, vector<16x1xf32>
    %82 = vector.extract_strided_slice %78 {offsets = [0, 0], sizes = [12, 24], strides = [1, 1]} : vector<12x38xf32> to vector<12x24xf32>
    %83 = vector.extract_strided_slice %78 {offsets = [0, 1], sizes = [12, 24], strides = [1, 1]} : vector<12x38xf32> to vector<12x24xf32>
    %84 = vector.extract_strided_slice %78 {offsets = [0, 2], sizes = [12, 24], strides = [1, 1]} : vector<12x38xf32> to vector<12x24xf32>
    %85 = vector.extract_strided_slice %78 {offsets = [0, 6], sizes = [12, 24], strides = [1, 1]} : vector<12x38xf32> to vector<12x24xf32>
    %86 = vector.extract_strided_slice %78 {offsets = [0, 7], sizes = [12, 24], strides = [1, 1]} : vector<12x38xf32> to vector<12x24xf32>
    %87 = vector.extract_strided_slice %78 {offsets = [0, 8], sizes = [12, 24], strides = [1, 1]} : vector<12x38xf32> to vector<12x24xf32>
    %88 = vector.extract_strided_slice %78 {offsets = [0, 12], sizes = [12, 24], strides = [1, 1]} : vector<12x38xf32> to vector<12x24xf32>
    %89 = vector.extract_strided_slice %78 {offsets = [0, 13], sizes = [12, 24], strides = [1, 1]} : vector<12x38xf32> to vector<12x24xf32>
    %90 = vector.extract_strided_slice %78 {offsets = [0, 14], sizes = [12, 24], strides = [1, 1]} : vector<12x38xf32> to vector<12x24xf32>
    %91 = tpu.concatenate %82, %83, %84, %85, %86, %87, %88, %89, %90 in 0 : vector<12x24xf32>, vector<12x24xf32>, vector<12x24xf32>, vector<12x24xf32>, vector<12x24xf32>, vector<12x24xf32>, vector<12x24xf32>, vector<12x24xf32>, vector<12x24xf32> -> vector<108x24xf32>
    %cst_31 = arith.constant dense<0.000000e+00> : vector<16x24xf32>
    %92 = tpu.matmul %80, %91, %cst_31 {dimension_numbers = #tpu.dot_dimension_numbers<[1], [0], [0], [1], [0, 0, 1, 1], [], []>} : vector<16x108xf32>, vector<108x24xf32>, vector<16x24xf32> -> vector<16x24xf32>
    %93 = vector.broadcast %81 : vector<16x1xf32> to vector<16x24xf32>
    %94 = arith.addf %92, %93 : vector<16x24xf32>
    %cst_32 = arith.constant 0.000000e+00 : f32
    %95 = vector.broadcast %cst_32 : f32 to vector<16x24xf32>
    %96 = arith.maximumf %94, %95 : vector<16x24xf32>
    %c0_33 = arith.constant 0 : index
    %c0_34 = arith.constant 0 : index
    %c0_35 = arith.constant 0 : index
    %97 = vector.load %arg20[%c0_33, %c0_34, %c0_35] : memref<1x16x24xf32, #tpu.memory_space<vmem>>, vector<1x16x24xf32>
    %98 = vector.shape_cast %97 : vector<1x16x24xf32> to vector<16x24xf32>
    %99 = vector.shape_cast %96 : vector<16x24xf32> to vector<1x16x24xf32>
    tpu.vector_store %arg20[%c0_33, %c0_34, %c0_35], %99 {strides = array<i32>} : memref<1x16x24xf32, #tpu.memory_space<vmem>>, vector<1x16x24xf32>,
    %c0_36 = arith.constant 0 : index
    %c0_37 = arith.constant 0 : index
    %100 = vector.load %arg18[%c0_36, %c0_37] : memref<1x24xf32, #tpu.memory_space<vmem>>, vector<1x24xf32>
    %cst_38 = arith.constant 0.000000e+00 : f32
    %101 = vector.broadcast %cst_38 : f32 to vector<16x7xf32>
    %102 = vector.broadcast %100 : vector<1x24xf32> to vector<16x24xf32>
    %103 = arith.mulf %96, %102 : vector<16x24xf32>
    %104 = tpu.concatenate %101, %103, %101 in 1 : vector<16x7xf32>, vector<16x24xf32>, vector<16x7xf32> -> vector<16x38xf32>
    %c0_39 = arith.constant 0 : index
    %c0_40 = arith.constant 0 : index
    %105 = vector.load %arg5[%c0_39, %c0_40] : memref<12x144xf32, #tpu.memory_space<vmem>>, vector<12x144xf32>
    %c0_41 = arith.constant 0 : index
    %c0_42 = arith.constant 0 : index
    %106 = vector.load %arg11[%c0_41, %c0_42] : memref<12x1xf32, #tpu.memory_space<vmem>>, vector<12x1xf32>
    %107 = vector.extract_strided_slice %104 {offsets = [0, 0], sizes = [16, 24], strides = [1, 1]} : vector<16x38xf32> to vector<16x24xf32>
    %108 = vector.extract_strided_slice %104 {offsets = [0, 1], sizes = [16, 24], strides = [1, 1]} : vector<16x38xf32> to vector<16x24xf32>
    %109 = vector.extract_strided_slice %104 {offsets = [0, 2], sizes = [16, 24], strides = [1, 1]} : vector<16x38xf32> to vector<16x24xf32>
    %110 = vector.extract_strided_slice %104 {offsets = [0, 6], sizes = [16, 24], strides = [1, 1]} : vector<16x38xf32> to vector<16x24xf32>
    %111 = vector.extract_strided_slice %104 {offsets = [0, 7], sizes = [16, 24], strides = [1, 1]} : vector<16x38xf32> to vector<16x24xf32>
    %112 = vector.extract_strided_slice %104 {offsets = [0, 8], sizes = [16, 24], strides = [1, 1]} : vector<16x38xf32> to vector<16x24xf32>
    %113 = vector.extract_strided_slice %104 {offsets = [0, 12], sizes = [16, 24], strides = [1, 1]} : vector<16x38xf32> to vector<16x24xf32>
    %114 = vector.extract_strided_slice %104 {offsets = [0, 13], sizes = [16, 24], strides = [1, 1]} : vector<16x38xf32> to vector<16x24xf32>
    %115 = vector.extract_strided_slice %104 {offsets = [0, 14], sizes = [16, 24], strides = [1, 1]} : vector<16x38xf32> to vector<16x24xf32>
    %116 = tpu.concatenate %107, %108, %109, %110, %111, %112, %113, %114, %115 in 0 : vector<16x24xf32>, vector<16x24xf32>, vector<16x24xf32>, vector<16x24xf32>, vector<16x24xf32>, vector<16x24xf32>, vector<16x24xf32>, vector<16x24xf32>, vector<16x24xf32> -> vector<144x24xf32>
    %cst_43 = arith.constant dense<0.000000e+00> : vector<12x24xf32>
    %117 = tpu.matmul %105, %116, %cst_43 {dimension_numbers = #tpu.dot_dimension_numbers<[1], [0], [0], [1], [0, 0, 1, 1], [], []>} : vector<12x144xf32>, vector<144x24xf32>, vector<12x24xf32> -> vector<12x24xf32>
    %118 = vector.broadcast %106 : vector<12x1xf32> to vector<12x24xf32>
    %119 = arith.addf %117, %118 : vector<12x24xf32>
    %c0_44 = arith.constant 0 : index
    %c0_45 = arith.constant 0 : index
    %120 = vector.load %arg16[%c0_44, %c0_45] : memref<24x102xf32, #tpu.memory_space<vmem>>, vector<24x102xf32>
    %121 = vector.extract_strided_slice %79 {offsets = [0, 7], sizes = [12, 24], strides = [1, 1]} : vector<12x38xf32> to vector<12x24xf32>
    %122 = tpu.concatenate %119, %121 in 0 : vector<12x24xf32>, vector<12x24xf32> -> vector<24x24xf32>
    %cst_46 = arith.constant dense<0.000000e+00> : vector<24x102xf32>
    %123 = tpu.matmul %122, %120, %cst_46 {dimension_numbers = #tpu.dot_dimension_numbers<[1], [0], [0], [1], [0, 0, 1, 1], [], []>} : vector<24x24xf32>, vector<24x102xf32>, vector<24x102xf32> -> vector<24x102xf32>
    %124 = vector.extract_strided_slice %123 {offsets = [0, 0], sizes = [12, 102], strides = [1, 1]} : vector<24x102xf32> to vector<12x102xf32>
    %125 = vector.extract_strided_slice %123 {offsets = [12, 0], sizes = [12, 102], strides = [1, 1]} : vector<24x102xf32> to vector<12x102xf32>
    %cst_47 = arith.constant 0.000000e+00 : f32
    %126 = vector.broadcast %cst_47 : f32 to vector<12x102xf32>
    %127 = arith.cmpf oeq, %125, %126 : vector<12x102xf32>
    %cst_48 = arith.constant 0.000000e+00 : f32
    %128 = vector.broadcast %cst_48 : f32 to vector<12x102xf32>
    %129 = arith.select %127, %124, %128 : vector<12x102xi1>, vector<12x102xf32>
    %cst_49 = arith.constant 1.000000e+00 : f32
    %130 = vector.broadcast %cst_49 : f32 to vector<12x102xf32>
    %131 = arith.cmpf oeq, %125, %130 : vector<12x102xf32>
    %cst_50 = arith.constant 0.000000e+00 : f32
    %132 = vector.broadcast %cst_50 : f32 to vector<12x102xf32>
    %133 = arith.select %131, %124, %132 : vector<12x102xi1>, vector<12x102xf32>
    %cst_51 = arith.constant 0.000000e+00 : f32
    %134 = vector.broadcast %cst_51 : f32 to vector<12x1xf32>
    %135 = vector.extract_strided_slice %133 {offsets = [0, 0], sizes = [12, 101], strides = [1, 1]} : vector<12x102xf32> to vector<12x101xf32>
    %136 = tpu.concatenate %134, %135 in 1 : vector<12x1xf32>, vector<12x101xf32> -> vector<12x102xf32>
    %137 = arith.addf %129, %136 : vector<12x102xf32>
    %cst_52 = arith.constant 2.000000e+00 : f32
    %138 = vector.broadcast %cst_52 : f32 to vector<12x102xf32>
    %139 = arith.cmpf oeq, %125, %138 : vector<12x102xf32>
    %cst_53 = arith.constant 0.000000e+00 : f32
    %140 = vector.broadcast %cst_53 : f32 to vector<12x102xf32>
    %141 = arith.select %139, %124, %140 : vector<12x102xi1>, vector<12x102xf32>
    %cst_54 = arith.constant 0.000000e+00 : f32
    %142 = vector.broadcast %cst_54 : f32 to vector<12x10xf32>
    %143 = vector.extract_strided_slice %141 {offsets = [0, 0], sizes = [12, 92], strides = [1, 1]} : vector<12x102xf32> to vector<12x92xf32>
    %144 = tpu.concatenate %142, %143 in 1 : vector<12x10xf32>, vector<12x92xf32> -> vector<12x102xf32>
    %145 = arith.addf %137, %144 : vector<12x102xf32>
    %cst_55 = arith.constant 3.000000e+00 : f32
    %146 = vector.broadcast %cst_55 : f32 to vector<12x102xf32>
    %147 = arith.cmpf oeq, %125, %146 : vector<12x102xf32>
    %cst_56 = arith.constant 0.000000e+00 : f32
    %148 = vector.broadcast %cst_56 : f32 to vector<12x102xf32>
    %149 = arith.select %147, %124, %148 : vector<12x102xi1>, vector<12x102xf32>
    %cst_57 = arith.constant 0.000000e+00 : f32
    %150 = vector.broadcast %cst_57 : f32 to vector<12x11xf32>
    %151 = vector.extract_strided_slice %149 {offsets = [0, 0], sizes = [12, 91], strides = [1, 1]} : vector<12x102xf32> to vector<12x91xf32>
    %152 = tpu.concatenate %150, %151 in 1 : vector<12x11xf32>, vector<12x91xf32> -> vector<12x102xf32>
    %153 = arith.addf %145, %152 : vector<12x102xf32>
    %cst_58 = arith.constant 0.000000e+00 : f32
    %154 = vector.broadcast %cst_58 : f32 to vector<12x102xf32>
    %155 = arith.maximumf %153, %154 : vector<12x102xf32>
    %c0_59 = arith.constant 0 : index
    %c0_60 = arith.constant 0 : index
    %156 = vector.load %arg6[%c0_59, %c0_60] : memref<8x108xf32, #tpu.memory_space<vmem>>, vector<8x108xf32>
    %c0_61 = arith.constant 0 : index
    %c0_62 = arith.constant 0 : index
    %157 = vector.load %arg12[%c0_61, %c0_62] : memref<8x1xf32, #tpu.memory_space<vmem>>, vector<8x1xf32>
    %158 = vector.extract_strided_slice %155 {offsets = [0, 0], sizes = [12, 80], strides = [1, 1]} : vector<12x102xf32> to vector<12x80xf32>
    %159 = vector.extract_strided_slice %155 {offsets = [0, 1], sizes = [12, 80], strides = [1, 1]} : vector<12x102xf32> to vector<12x80xf32>
    %160 = vector.extract_strided_slice %155 {offsets = [0, 2], sizes = [12, 80], strides = [1, 1]} : vector<12x102xf32> to vector<12x80xf32>
    %161 = vector.extract_strided_slice %155 {offsets = [0, 10], sizes = [12, 80], strides = [1, 1]} : vector<12x102xf32> to vector<12x80xf32>
    %162 = vector.extract_strided_slice %155 {offsets = [0, 11], sizes = [12, 80], strides = [1, 1]} : vector<12x102xf32> to vector<12x80xf32>
    %163 = vector.extract_strided_slice %155 {offsets = [0, 12], sizes = [12, 80], strides = [1, 1]} : vector<12x102xf32> to vector<12x80xf32>
    %164 = vector.extract_strided_slice %155 {offsets = [0, 20], sizes = [12, 80], strides = [1, 1]} : vector<12x102xf32> to vector<12x80xf32>
    %165 = vector.extract_strided_slice %155 {offsets = [0, 21], sizes = [12, 80], strides = [1, 1]} : vector<12x102xf32> to vector<12x80xf32>
    %166 = vector.extract_strided_slice %155 {offsets = [0, 22], sizes = [12, 80], strides = [1, 1]} : vector<12x102xf32> to vector<12x80xf32>
    %167 = tpu.concatenate %158, %159, %160, %161, %162, %163, %164, %165, %166 in 0 : vector<12x80xf32>, vector<12x80xf32>, vector<12x80xf32>, vector<12x80xf32>, vector<12x80xf32>, vector<12x80xf32>, vector<12x80xf32>, vector<12x80xf32>, vector<12x80xf32> -> vector<108x80xf32>
    %cst_63 = arith.constant dense<0.000000e+00> : vector<8x80xf32>
    %168 = tpu.matmul %156, %167, %cst_63 {dimension_numbers = #tpu.dot_dimension_numbers<[1], [0], [0], [1], [0, 0, 1, 1], [], []>} : vector<8x108xf32>, vector<108x80xf32>, vector<8x80xf32> -> vector<8x80xf32>
    %169 = vector.broadcast %157 : vector<8x1xf32> to vector<8x80xf32>
    %170 = arith.addf %168, %169 : vector<8x80xf32>
    %c0_64 = arith.constant 0 : index
    %c0_65 = arith.constant 0 : index
    %171 = vector.load %arg17[%c0_64, %c0_65] : memref<80x326xf32, #tpu.memory_space<vmem>>, vector<80x326xf32>
    %172 = vector.extract_strided_slice %40 {offsets = [0, 11], sizes = [8, 80], strides = [1, 1]} : vector<8x102xf32> to vector<8x80xf32>
    %173 = tpu.concatenate %170, %172 in 0 : vector<8x80xf32>, vector<8x80xf32> -> vector<16x80xf32>
    %cst_66 = arith.constant dense<0.000000e+00> : vector<16x326xf32>
    %174 = tpu.matmul %173, %171, %cst_66 {dimension_numbers = #tpu.dot_dimension_numbers<[1], [0], [0], [1], [0, 0, 1, 1], [], []>} : vector<16x80xf32>, vector<80x326xf32>, vector<16x326xf32> -> vector<16x326xf32>
    %175 = vector.extract_strided_slice %174 {offsets = [0, 0], sizes = [8, 326], strides = [1, 1]} : vector<16x326xf32> to vector<8x326xf32>
    %176 = vector.extract_strided_slice %174 {offsets = [8, 0], sizes = [8, 326], strides = [1, 1]} : vector<16x326xf32> to vector<8x326xf32>
    %cst_67 = arith.constant 0.000000e+00 : f32
    %177 = vector.broadcast %cst_67 : f32 to vector<8x326xf32>
    %178 = arith.cmpf oeq, %176, %177 : vector<8x326xf32>
    %cst_68 = arith.constant 0.000000e+00 : f32
    %179 = vector.broadcast %cst_68 : f32 to vector<8x326xf32>
    %180 = arith.select %178, %175, %179 : vector<8x326xi1>, vector<8x326xf32>
    %cst_69 = arith.constant 1.000000e+00 : f32
    %181 = vector.broadcast %cst_69 : f32 to vector<8x326xf32>
    %182 = arith.cmpf oeq, %176, %181 : vector<8x326xf32>
    %cst_70 = arith.constant 0.000000e+00 : f32
    %183 = vector.broadcast %cst_70 : f32 to vector<8x326xf32>
    %184 = arith.select %182, %175, %183 : vector<8x326xi1>, vector<8x326xf32>
    %cst_71 = arith.constant 0.000000e+00 : f32
    %185 = vector.broadcast %cst_71 : f32 to vector<8x1xf32>
    %186 = vector.extract_strided_slice %184 {offsets = [0, 0], sizes = [8, 325], strides = [1, 1]} : vector<8x326xf32> to vector<8x325xf32>
    %187 = tpu.concatenate %185, %186 in 1 : vector<8x1xf32>, vector<8x325xf32> -> vector<8x326xf32>
    %188 = arith.addf %180, %187 : vector<8x326xf32>
    %cst_72 = arith.constant 2.000000e+00 : f32
    %189 = vector.broadcast %cst_72 : f32 to vector<8x326xf32>
    %190 = arith.cmpf oeq, %176, %189 : vector<8x326xf32>
    %cst_73 = arith.constant 0.000000e+00 : f32
    %191 = vector.broadcast %cst_73 : f32 to vector<8x326xf32>
    %192 = arith.select %190, %175, %191 : vector<8x326xi1>, vector<8x326xf32>
    %cst_74 = arith.constant 0.000000e+00 : f32
    %193 = vector.broadcast %cst_74 : f32 to vector<8x18xf32>
    %194 = vector.extract_strided_slice %192 {offsets = [0, 0], sizes = [8, 308], strides = [1, 1]} : vector<8x326xf32> to vector<8x308xf32>
    %195 = tpu.concatenate %193, %194 in 1 : vector<8x18xf32>, vector<8x308xf32> -> vector<8x326xf32>
    %196 = arith.addf %188, %195 : vector<8x326xf32>
    %cst_75 = arith.constant 3.000000e+00 : f32
    %197 = vector.broadcast %cst_75 : f32 to vector<8x326xf32>
    %198 = arith.cmpf oeq, %176, %197 : vector<8x326xf32>
    %cst_76 = arith.constant 0.000000e+00 : f32
    %199 = vector.broadcast %cst_76 : f32 to vector<8x326xf32>
    %200 = arith.select %198, %175, %199 : vector<8x326xi1>, vector<8x326xf32>
    %cst_77 = arith.constant 0.000000e+00 : f32
    %201 = vector.broadcast %cst_77 : f32 to vector<8x19xf32>
    %202 = vector.extract_strided_slice %200 {offsets = [0, 0], sizes = [8, 307], strides = [1, 1]} : vector<8x326xf32> to vector<8x307xf32>
    %203 = tpu.concatenate %201, %202 in 1 : vector<8x19xf32>, vector<8x307xf32> -> vector<8x326xf32>
    %204 = arith.addf %196, %203 : vector<8x326xf32>
    %cst_78 = arith.constant 0.000000e+00 : f32
    %205 = vector.broadcast %cst_78 : f32 to vector<8x326xf32>
    %206 = arith.maximumf %204, %205 : vector<8x326xf32>
    %c0_79 = arith.constant 0 : index
    %c0_80 = arith.constant 0 : index
    %207 = vector.load %arg7[%c0_79, %c0_80] : memref<3x72xf32, #tpu.memory_space<vmem>>, vector<3x72xf32>
    %c0_81 = arith.constant 0 : index
    %c0_82 = arith.constant 0 : index
    %208 = vector.load %arg13[%c0_81, %c0_82] : memref<3x1xf32, #tpu.memory_space<vmem>>, vector<3x1xf32>
    %209 = vector.extract_strided_slice %206 {offsets = [0, 0], sizes = [8, 288], strides = [1, 1]} : vector<8x326xf32> to vector<8x288xf32>
    %210 = vector.extract_strided_slice %206 {offsets = [0, 1], sizes = [8, 288], strides = [1, 1]} : vector<8x326xf32> to vector<8x288xf32>
    %211 = vector.extract_strided_slice %206 {offsets = [0, 2], sizes = [8, 288], strides = [1, 1]} : vector<8x326xf32> to vector<8x288xf32>
    %212 = vector.extract_strided_slice %206 {offsets = [0, 18], sizes = [8, 288], strides = [1, 1]} : vector<8x326xf32> to vector<8x288xf32>
    %213 = vector.extract_strided_slice %206 {offsets = [0, 19], sizes = [8, 288], strides = [1, 1]} : vector<8x326xf32> to vector<8x288xf32>
    %214 = vector.extract_strided_slice %206 {offsets = [0, 20], sizes = [8, 288], strides = [1, 1]} : vector<8x326xf32> to vector<8x288xf32>
    %215 = vector.extract_strided_slice %206 {offsets = [0, 36], sizes = [8, 288], strides = [1, 1]} : vector<8x326xf32> to vector<8x288xf32>
    %216 = vector.extract_strided_slice %206 {offsets = [0, 37], sizes = [8, 288], strides = [1, 1]} : vector<8x326xf32> to vector<8x288xf32>
    %217 = vector.extract_strided_slice %206 {offsets = [0, 38], sizes = [8, 288], strides = [1, 1]} : vector<8x326xf32> to vector<8x288xf32>
    %218 = tpu.concatenate %209, %210, %211, %212, %213, %214, %215, %216, %217 in 0 : vector<8x288xf32>, vector<8x288xf32>, vector<8x288xf32>, vector<8x288xf32>, vector<8x288xf32>, vector<8x288xf32>, vector<8x288xf32>, vector<8x288xf32>, vector<8x288xf32> -> vector<72x288xf32>
    %cst_83 = arith.constant dense<0.000000e+00> : vector<3x288xf32>
    %219 = tpu.matmul %207, %218, %cst_83 {dimension_numbers = #tpu.dot_dimension_numbers<[1], [0], [0], [1], [0, 0, 1, 1], [], []>} : vector<3x72xf32>, vector<72x288xf32>, vector<3x288xf32> -> vector<3x288xf32>
    %220 = vector.broadcast %208 : vector<3x1xf32> to vector<3x288xf32>
    %221 = arith.addf %219, %220 : vector<3x288xf32>
    %c0_84 = arith.constant 0 : index
    %c0_85 = arith.constant 0 : index
    %c0_86 = arith.constant 0 : index
    %222 = vector.load %arg19[%c0_84, %c0_85, %c0_86] : memref<1x3x288xf32, #tpu.memory_space<vmem>>, vector<1x3x288xf32>
    %223 = vector.shape_cast %222 : vector<1x3x288xf32> to vector<3x288xf32>
    %224 = vector.shape_cast %221 : vector<3x288xf32> to vector<1x3x288xf32>
    tpu.vector_store %arg19[%c0_84, %c0_85, %c0_86], %224 {strides = array<i32>} : memref<1x3x288xf32, #tpu.memory_space<vmem>>, vector<1x3x288xf32>,
    return
  }
  func.func @transform_0(%arg0: i32) -> (i32, i32, i32) {
    %c0_i32 = arith.constant 0 : i32
    %c0_i32_0 = arith.constant 0 : i32
    %c0_i32_1 = arith.constant 0 : i32
    return %arg0, %c0_i32, %c0_i32_0 : i32, i32, i32
  }
  func.func @transform_1(%arg0: i32) -> (i32, i32) {
    %c0_i32 = arith.constant 0 : i32
    %c0_i32_0 = arith.constant 0 : i32
    %c0_i32_1 = arith.constant 0 : i32
    return %c0_i32, %c0_i32_0 : i32, i32
  }
  func.func @transform_2(%arg0: i32) -> (i32, i32) {
    %c0_i32 = arith.constant 0 : i32
    %c0_i32_0 = arith.constant 0 : i32
    %c0_i32_1 = arith.constant 0 : i32
    return %c0_i32, %c0_i32_0 : i32, i32
  }
  func.func @transform_3(%arg0: i32) -> (i32, i32) {
    %c0_i32 = arith.constant 0 : i32
    %c0_i32_0 = arith.constant 0 : i32
    %c0_i32_1 = arith.constant 0 : i32
    return %c0_i32, %c0_i32_0 : i32, i32
  }
  func.func @transform_4(%arg0: i32) -> (i32, i32) {
    %c0_i32 = arith.constant 0 : i32
    %c0_i32_0 = arith.constant 0 : i32
    %c0_i32_1 = arith.constant 0 : i32
    return %c0_i32, %c0_i32_0 : i32, i32
  }
  func.func @transform_5(%arg0: i32) -> (i32, i32) {
    %c0_i32 = arith.constant 0 : i32
    %c0_i32_0 = arith.constant 0 : i32
    %c0_i32_1 = arith.constant 0 : i32
    return %c0_i32, %c0_i32_0 : i32, i32
  }
  func.func @transform_6(%arg0: i32) -> (i32, i32) {
    %c0_i32 = arith.constant 0 : i32
    %c0_i32_0 = arith.constant 0 : i32
    %c0_i32_1 = arith.constant 0 : i32
    return %c0_i32, %c0_i32_0 : i32, i32
  }
  func.func @transform_7(%arg0: i32) -> (i32, i32) {
    %c0_i32 = arith.constant 0 : i32
    %c0_i32_0 = arith.constant 0 : i32
    %c0_i32_1 = arith.constant 0 : i32
    return %c0_i32, %c0_i32_0 : i32, i32
  }
  func.func @transform_8(%arg0: i32) -> (i32, i32) {
    %c0_i32 = arith.constant 0 : i32
    %c0_i32_0 = arith.constant 0 : i32
    %c0_i32_1 = arith.constant 0 : i32
    return %c0_i32, %c0_i32_0 : i32, i32
  }
  func.func @transform_9(%arg0: i32) -> (i32, i32) {
    %c0_i32 = arith.constant 0 : i32
    %c0_i32_0 = arith.constant 0 : i32
    %c0_i32_1 = arith.constant 0 : i32
    return %c0_i32, %c0_i32_0 : i32, i32
  }
  func.func @transform_10(%arg0: i32) -> (i32, i32) {
    %c0_i32 = arith.constant 0 : i32
    %c0_i32_0 = arith.constant 0 : i32
    %c0_i32_1 = arith.constant 0 : i32
    return %c0_i32, %c0_i32_0 : i32, i32
  }
  func.func @transform_11(%arg0: i32) -> (i32, i32) {
    %c0_i32 = arith.constant 0 : i32
    %c0_i32_0 = arith.constant 0 : i32
    %c0_i32_1 = arith.constant 0 : i32
    return %c0_i32, %c0_i32_0 : i32, i32
  }
  func.func @transform_12(%arg0: i32) -> (i32, i32) {
    %c0_i32 = arith.constant 0 : i32
    %c0_i32_0 = arith.constant 0 : i32
    %c0_i32_1 = arith.constant 0 : i32
    return %c0_i32, %c0_i32_0 : i32, i32
  }
  func.func @transform_13(%arg0: i32) -> (i32, i32) {
    %c0_i32 = arith.constant 0 : i32
    %c0_i32_0 = arith.constant 0 : i32
    %c0_i32_1 = arith.constant 0 : i32
    return %c0_i32, %c0_i32_0 : i32, i32
  }
  func.func @transform_14(%arg0: i32) -> (i32, i32) {
    %c0_i32 = arith.constant 0 : i32
    %c0_i32_0 = arith.constant 0 : i32
    %c0_i32_1 = arith.constant 0 : i32
    return %c0_i32, %c0_i32_0 : i32, i32
  }
  func.func @transform_15(%arg0: i32) -> (i32, i32) {
    %c0_i32 = arith.constant 0 : i32
    %c0_i32_0 = arith.constant 0 : i32
    %c0_i32_1 = arith.constant 0 : i32
    return %c0_i32, %c0_i32_0 : i32, i32
  }
  func.func @transform_16(%arg0: i32) -> (i32, i32) {
    %c0_i32 = arith.constant 0 : i32
    %c0_i32_0 = arith.constant 0 : i32
    %c0_i32_1 = arith.constant 0 : i32
    return %c0_i32, %c0_i32_0 : i32, i32
  }
  func.func @transform_17(%arg0: i32) -> (i32, i32) {
    %c0_i32 = arith.constant 0 : i32
    %c0_i32_0 = arith.constant 0 : i32
    %c0_i32_1 = arith.constant 0 : i32
    return %c0_i32, %c0_i32_0 : i32, i32
  }
  func.func @transform_18(%arg0: i32) -> (i32, i32, i32) {
    %c0_i32 = arith.constant 0 : i32
    %c0_i32_0 = arith.constant 0 : i32
    %c0_i32_1 = arith.constant 0 : i32
    return %arg0, %c0_i32, %c0_i32_0 : i32, i32, i32
  }
  func.func @transform_19(%arg0: i32) -> (i32, i32, i32) {
    %c0_i32 = arith.constant 0 : i32
    %c0_i32_0 = arith.constant 0 : i32
    %c0_i32_1 = arith.constant 0 : i32
    return %arg0, %c0_i32, %c0_i32_0 : i32, i32, i32
  }
}

</mosaic_0001>

<bundles_post_ra>
// kernel: autoencoder_forward.1
= control target key start
LH: loop header
LB: loop body
LE: loop exit
PB: predicated region body
PF: predicated region fallthrough
CT: control target
= control target key end

     0   :  { %s4574_s0 = inlined_call_operand.vmem [shape: f32[2,3,326], index: 0, kind: input, shape index: {}]   ;;  %s4575_s1 = inlined_call_operand.vmem [shape: f32[8,27], index: 1, kind: input, shape index: {}]   ;;  %s4576_s2 = inlined_call_operand.vmem [shape: f32[12,72], index: 2, kind: input, shape index: {}]   ;;  %s4577_s3 = inlined_call_operand.vmem [shape: f32[16,108], index: 3, kind: input, shape index: {}]   ;;  %s4578_s4 = inlined_call_operand.vmem [shape: f32[12,144], index: 4, kind: input, shape index: {}]   ;;  %s4579_s5 = inlined_call_operand.vmem [shape: f32[8,108], index: 5, kind: input, shape index: {}]   ;;  %s4580_s6 = inlined_call_operand.vmem [shape: f32[3,72], index: 6, kind: input, shape index: {}]   ;;  %s4581_s7 = inlined_call_operand.vmem [shape: f32[8,1], index: 7, kind: input, shape index: {}]   ;;  %s4582_s8 = inlined_call_operand.vmem [shape: f32[12,1], index: 8, kind: input, shape index: {}]   ;;  %s4583_s9 = inlined_call_operand.vmem [shape: f32[16,1], index: 9, kind: input, shape index: {}]   ;;  %s4584_s10 = inlined_call_operand.vmem [shape: f32[12,1], index: 10, kind: input, shape index: {}]   ;;  %s4585_s11 = inlined_call_operand.vmem [shape: f32[8,1], index: 11, kind: input, shape index: {}]   ;;  %s4586_s12 = inlined_call_operand.vmem [shape: f32[3,1], index: 12, kind: input, shape index: {}]   ;;  %s4587_s13 = inlined_call_operand.vmem [shape: f32[269,102], index: 13, kind: input, shape index: {}]   ;;  %s4588_s14 = inlined_call_operand.vmem [shape: f32[69,38], index: 14, kind: input, shape index: {}]   ;;  %s4589_s15 = inlined_call_operand.vmem [shape: f32[24,102], index: 15, kind: input, shape index: {}]   ;;  %s4590_s16 = inlined_call_operand.vmem [shape: f32[80,326], index: 16, kind: input, shape index: {}]   ;;  %s4591_s17 = inlined_call_operand.vmem [shape: f32[1,24], index: 17, kind: input, shape index: {}]   ;;  %s4592_s18 = inlined_call_operand.vmem [shape: f32[2,3,288], index: 18, kind: output, shape index: {0}]   ;;  %s4593_s19 = inlined_call_operand.vmem [shape: f32[2,16,24], index: 19, kind: output, shape index: {1}]  }
   0x1   :  { %4639 = sst [smem:[#allocation2_spill]] %s4574_s0  ;;  %s3781_s0 = smov 0  }
   0x2   :  { %4640 = sst [smem:[#allocation3_spill]] %s4575_s1 }
   0x3   :  { %4641 = sst [smem:[#allocation4_spill]] %s4576_s2 }
   0x4   :  { %4642 = sst [smem:[#allocation5_spill]] %s4577_s3 }
   0x5   :  { %4643 = sst [smem:[#allocation6_spill]] %s4581_s7 }
   0x6   :  { %4644 = sst [smem:[#allocation7_spill]] %s4582_s8 }
   0x7   :  { %4645 = sst [smem:[#allocation8_spill]] %s4583_s9 }
   0x8   :  { %4646 = sst [smem:[#allocation9_spill]] %s4587_s13 }
   0x9   :  { %4647 = sst [smem:[#allocation10_spill]] %s4588_s14 }
   0xa LB: > { %s2786_s30 = sadd.s32 4294967295, %s3647_s0   ;;  %p2790_p0 = scmp.ge.s32.totalorder %s3647_s0, 1  ;;  %s3647_s0 = sphi %s3781_s0, %s30_s0  }
   0xb   : > { %p540_p1 = scmp.lt.s32.totalorder %s3647_s0, 3 }
   0xd   : > { %p541_p2 = pnand %p2790_p0, %p540_p1 }
   0xe   : > { %p601_p3 = scmp.lt.s32.totalorder (!%p541_p2), %s2786_s30, 1  ;;  %s4648_s22 = sld [smem:[#allocation2_spill]] (!%p541_p2)  ;;  %v3655_v30 = vmov (!%p541_p2), 0.0   ;;  %v3658_v33 = vmov (!%p541_p2), 0   ;;  %vm4637_vm0 = vcmask (!%p541_p2), 891904   ;;  %vm663_vm1 = vcmask (!%p541_p2), 900096  }
   0xf   : > { %544 = sbr.rel (%p541_p2) target bundleno = 4646 (0x1226), region = 92  ;;  %s4612_s23 = smov (!%p541_p2), 110   ;;  %844 = vmatprep.mubr.f32.mxu1 (!%p541_p2), %v3655_v30  ;;  %3466 = vset.pattern.permute.xlu0 (!%p541_p2), %v3658_v33  ;;  %vm633_vm2 = vcmask (!%p541_p2), 1039360   ;;  %vm4638_vm3 = vcmask (!%p541_p2), 1031168   ;;  %vm745_vm4 = vcmask (!%p541_p2), 1040384   ;;  %vm692_vm5 = vcmask (!%p541_p2), 883712  }
  0x10   : > { %s4620_s24 = smov (!%p541_p2), 126   ;;  %s4604_s25 = smov (!%p541_p2), 109   ;;  %3467 = vset.pattern.permute.xlu1 (!%p541_p2), %v3658_v33  ;;  %vm737_vm6 = vcmask (!%p541_p2), 1042432   ;;  %vm741_vm7 = vcmask (!%p541_p2), 1045504   ;;  %vm749_vm8 = vcmask (!%p541_p2), 1043456   ;;  %vm753_vm9 = vcmask (!%p541_p2), 1046528  }
  0x11   : > { %s4623_s3 = smov (!%p541_p2), 127   ;;  %s4610_s26 = smov (!%p541_p2), 108   ;;  %vm4596_vm10 = vcmask (!%p541_p2), 752640   ;;  %vm4632_vm11 = vcmask (!%p541_p2), 744448   ;;  %vm757_vm12 = vcmask (!%p541_p2), 1041408   ;;  %vm761_vm13 = vcmask (!%p541_p2), 1044480  }
  0x12   : > { %s4602_s27 = smov (!%p541_p2), 92   ;;  %s4600_s28 = smov (!%p541_p2), 91   ;;  %vm4631_vm14 = vcmask (!%p541_p2), 736256   ;;  %vm3659_vm15 = vmmov (!%p541_p2), 1  }
  0x13   : > { %s4598_s29 = smov (!%p541_p2), 90   ;;  %s4649_s7 = sld [smem:[#allocation6_spill]] (!%p541_p2) }
  0x14   : > { %s4652_s21 = sld [smem:[#allocation3_spill]] (!%p541_p2)  ;;  %s4653_s13 = sld [smem:[#allocation9_spill]] (!%p541_p2) }
  0x15   : > { %s4626_s1 = smov (!%p541_p2), 118   ;;  %s4656_s8 = sld [smem:[#allocation7_spill]] (!%p541_p2) }
  0x16   : > { %s4697_s30 = smov (!%p601_p3, %s2786_s30), 1  ;;  %s4657_s14 = sld [smem:[#allocation10_spill]] }
  0x17   : > { %s4597_s20 = smul.u32 12, %s4697_s30  ;;  %s4664_s9 = sld [smem:[#allocation8_spill]] }
  0x19   : > { %s605_s2 = scalar_lea.vmem %s4648_s22, %s4597_s20  ;;  %v619_v32 = vld [vmem:[%s4649_s7] sm:$0xff]  ;;  %s4606_s20 = smov 18  }
  0x1a   : > { %v3797_v0 = vld [vmem:[%s605_s2] sm:$0x77]  ;;  %v3799_v1 = vld [vmem:[%s605_s2 + $0x8] sm:$0x7]  ;;  %s4618_s2 = smov 116   ;;  %s4658_s22 = smov 1  }
  0x1b   : > { %v654_v2 = vrot.slane %v3797_v0, 7  ;;  %v639_v3 = vrot.slane %v3797_v0, 2  ;;  %v670_v4 = vcombine.low %v3799_v1, %v3799_v1  ;;  %v3807_v5 = vcombine.high %v3797_v0, %v3797_v0  ;;  %s4672_s7 = smov 115  }
  0x1c   : > { %v624_v7 = vrot.slane %v3797_v0, 5  ;;  %v641_v8 = vrot.slane %v3799_v1, 2  ;;  %v669_v10 = vcombine.low %v3797_v0, %v3797_v0  ;;  %v656_v11 = vrot.slane %v3799_v1, 7 }
  0x1d   : > { %657 = vrot.lane.b32.xlu0 %v654_v2, %s4612_s23  ;;  %642 = vrot.lane.b32.xlu1 %v639_v3, %s4620_s24  ;;  %v3426_v6 = vpack.i.bf16 %v670_v4, %v3797_v0  ;;  %v640_v9 = vrot.slane %v3807_v5, 2  ;;  %v655_v13 = vrot.slane %v3807_v5, 7  ;;  %v625_v14 = vrot.slane %v3807_v5, 5 }
  0x1e   : > { %v626_v15 = vrot.slane %v3799_v1, 5  ;;  %v684_v18 = vrot.slane %v3807_v5, 1  ;;  %v685_v19 = vrot.slane %v3799_v1, 1  ;;  %v683_v21 = vrot.slane %v3797_v0, 1 }
  0x1f   : > { %v3431_v12 = vpack.i.bf16 %v641_v8, %v640_v9  ;;  %v3436_v16 = vpack.i.bf16 %v656_v11, %v655_v13  ;;  %v699_v22 = vrot.slane %v3807_v5, 6  ;;  %v700_v23 = vrot.slane %v3799_v1, 6 }
  0x20   : > { %v3441_v17 = vpack.i.bf16 %v626_v15, %v625_v14  ;;  %v3446_v20 = vpack.i.bf16 %v685_v19, %v684_v18  ;;  %v698_v25 = vrot.slane %v3797_v0, 6  ;;  %v714_v26 = vrot.slane %v3807_v5, 3 }
  0x21   : > { %3427 = vrot.lane.b32.xlu1 %v3426_v6, %s4604_s25  ;;  %627 = vrot.lane.b32.xlu0 %v624_v7, %s4623_s3  ;;  %v3451_v24 = vpack.i.bf16 %v700_v23, %v699_v22  ;;  %v715_v27 = vrot.slane %v3799_v1, 3  ;;  %v713_v29 = vrot.slane %v3797_v0, 3  ;;  %v3461_v31 = vpack.i.bf16 %v3799_v1, %v3807_v5 }
  0x23   : > { %v3456_v28 = vpack.i.bf16 %v715_v27, %v714_v26 }
  0x25   : > { %671 = vrot.lane.b32.xlu1 %v669_v10, %s4604_s25  ;;  %3432 = vrot.lane.b32.xlu0 %v3431_v12, %s4620_s24  ;;  %s4608_s25 = smov 1  }
  0x29   : > { %3437 = vrot.lane.b32.xlu0 %v3436_v16, %s4612_s23  ;;  %3442 = vrot.lane.b32.xlu1 %v3441_v17, %s4623_s3 }
  0x2d   : > { %3447 = vrot.lane.b32.xlu0 %v3446_v20, %s4610_s26  ;;  %686 = vrot.lane.b32.xlu1 %v683_v21, %s4610_s26  ;;  %s4633_s26 = smov 10  }
  0x31   : > { %3452 = vrot.lane.b32.xlu0 %v3451_v24, %s4602_s27  ;;  %701 = vrot.lane.b32.xlu1 %v698_v25, %s4602_s27  ;;  %s4616_s27 = smov 106  }
  0x35   : > { %3457 = vrot.lane.b32.xlu0 %v3456_v28, %s4600_s28  ;;  %716 = vrot.lane.b32.xlu1 %v713_v29, %s4600_s28  ;;  %s4617_s28 = smov 107  }
  0x39   : > { %3462 = vrot.lane.b32.xlu0 %v3461_v31, %s4598_s29  ;;  %728 = vrot.lane.b32.xlu1 %v3797_v0, %s4598_s29  ;;  %s4622_s29 = smov 111  }
  0x3d   : > { %767 = vperm.xlu0 %3466, %v619_v32  }
  0x8f   : > { %v658_v34 = vpop.permute.xlu0 %657  ;;  %v643_v35 = vpop.permute.xlu1 %642 }
  0x93   : > { %v3851_v36 = vpop.permute.xlu1 %3427  ;;  %v628_v37 = vpop.permute.xlu0 %627 }
  0x94   : > { %v3430_v48 = vunpack.i.h.bf16 %v3851_v36  ;;  %v3429_v49 = vunpack.i.l.bf16 %v3851_v36  ;;  %v3660_v36 = vmov 0.0|0.0  }
  0x96   : > { %v679_v62 = vsel %vm4637_vm0, %v3429_v49, %v3430_v48 }
  0x97   : > { %v672_v38 = vpop.permute.xlu1 %671  ;;  %v3433_v39 = vpop.permute.xlu0 %3432 }
  0x98   : > { %v3853_v40 = vunpack.i.h.bf16 %v3433_v39  ;;  %v3434_v41 = vunpack.i.l.bf16 %v3433_v39  ;;  %v678_v61 = vsel %vm4637_vm0, %v672_v38, %v3429_v49 }
  0x9a   : > { %v650_v52 = vsel %vm4638_vm3, %v3434_v41, %v3853_v40  ;;  %v649_v60 = vsel %vm4638_vm3, %v643_v35, %v3434_v41 }
  0x9b   : > { %v3855_v42 = vpop.permute.xlu0 %3437  ;;  %v3857_v43 = vpop.permute.xlu1 %3442 }
  0x9c   : > { %v3440_v44 = vunpack.i.h.bf16 %v3855_v42  ;;  %v3439_v45 = vunpack.i.l.bf16 %v3855_v42  ;;  %v3445_v46 = vunpack.i.h.bf16 %v3857_v43  ;;  %v3444_v47 = vunpack.i.l.bf16 %v3857_v43  ;;  %v618_v43 = vld [vmem:[%s4652_s21] sm:$0xff]  ;;  %s4614_s21 = smov 117  }
  0x9e   : > { %v664_v50 = vsel %vm663_vm1, %v658_v34, %v3439_v45  ;;  %v635_v51 = vsel %vm633_vm2, %v3444_v47, %v3445_v46  ;;  %v665_v53 = vsel %vm663_vm1, %v3439_v45, %v3440_v44  ;;  %v634_v63 = vsel %vm633_vm2, %v628_v37, %v3444_v47 }
  0x9f   : > { %v3448_v54 = vpop.permute.xlu0 %3447  ;;  %v687_v55 = vpop.permute.xlu1 %686  ;;  %v747_v56 = vsel %vm745_vm4, %v650_v52, %v665_v53  ;;  %v739_v59 = vsel %vm737_vm6, %v3807_v5, %v635_v51  ;;  %v746_v2 = vsel %vm745_vm4, %v649_v60, %v664_v50  ;;  %v738_v5 = vsel %vm737_vm6, %v3797_v0, %v634_v63  ;;  %v938_v63 = vld [vmem:[%s4653_s13 + $0x88] sm:$0xff] }
  0xa0   : > { %v3873_v57 = vunpack.i.h.bf16 %v3448_v54  ;;  %v3449_v58 = vunpack.i.l.bf16 %v3448_v54  ;;  %v751_v6 = vsel %vm749_vm8, %v747_v56, %v679_v62  ;;  %v743_v9 = vsel %vm741_vm7, %v739_v59, %v650_v52  ;;  %v937_v62 = vld [vmem:[%s4653_s13 + $0x80] sm:$0xff] }
  0xa1   : > { %v750_v11 = vsel %vm749_vm8, %v746_v2, %v678_v61  ;;  %v742_v13 = vsel %vm741_vm7, %v738_v5, %v649_v60  ;;  %v748_v31 = vsel %vm745_vm4, %v3853_v40, %v3440_v44  ;;  %v740_v42 = vsel %vm737_vm6, %v3799_v1, %v3445_v46  ;;  %v921_v2 = vld [vmem:[%s4653_s13] sm:$0xff]  ;;  %v922_v5 = vld [vmem:[%s4653_s13 + $0x8] sm:$0xff] }
  0xa2   : > { %v693_v3 = vsel %vm692_vm5, %v687_v55, %v3449_v58  ;;  %v694_v4 = vsel %vm692_vm5, %v3449_v58, %v3873_v57  ;;  %v752_v44 = vsel %vm749_vm8, %v748_v31, %v3430_v48  ;;  %vm770_vm4 = vcmask 220160  }
  0xa3   : > { %v3453_v7 = vpop.permute.xlu0 %3452  ;;  %v702_v8 = vpop.permute.xlu1 %701  ;;  %v755_v10 = vsel %vm753_vm9, %v751_v6, %v694_v4  ;;  %v754_v14 = vsel %vm753_vm9, %v750_v11, %v693_v3  ;;  %v756_v45 = vsel %vm753_vm9, %v752_v44, %v3873_v57  ;;  %v744_v1 = vsel %vm741_vm7, %v740_v42, %v3853_v40  ;;  %v949_v42 = vld [vmem:[%s4653_s13 + $0xe0] sm:$0xff]  ;;  %v950_v44 = vld [vmem:[%s4653_s13 + $0xe8] sm:$0xff] }
  0xa4   : > { %v3151_v12 = vpack.c.bf16 %v755_v10, %v743_v9  ;;  %v3153_v15 = vpack.c.bf16 %v754_v14, %v742_v13  ;;  %v3455_v16 = vunpack.i.h.bf16 %v3453_v7  ;;  %v3454_v17 = vunpack.i.l.bf16 %v3453_v7  ;;  %v939_v7 = vld [vmem:[%s4653_s13 + $0x90] sm:$0xff]  ;;  %v924_v14 = vld [vmem:[%s4653_s13 + $0x18] sm:$0xff] }
  0xa5   : > { %v3162_v46 = vpack.c.bf16 %v756_v45, %v744_v1  ;;  %vm1063_vm7 = vcmask 105472   ;;  %v3168_v6 = vpack.c.bf16 %v938_v63, %v937_v62  ;;  %v3170_v10 = vpack.c.bf16 %v922_v5, %v921_v2  ;;  %v923_v13 = vld [vmem:[%s4653_s13 + $0x10] sm:$0xff]  ;;  %v933_v1 = vld [vmem:[%s4653_s13 + $0x60] sm:$0xff] }
  0xa6   : > { %3152 = vmatprep.subr.bf16.mxu1 %v3151_v12  ;;  %v708_v21 = vsel %vm4596_vm10, %v702_v8, %v3454_v17  ;;  %v709_v22 = vsel %vm4596_vm10, %v3454_v17, %v3455_v16  ;;  %vm3909_vm10 = vmpackc.low %vm737_vm6, %vm3659_vm15  ;;  %v760_v47 = vsel %vm757_vm12, %v3873_v57, %v3455_v16  ;;  %vm3661_vm6 = vmmov 0   ;;  %v940_v8 = vld [vmem:[%s4653_s13 + $0x98] sm:$0xff]  ;;  %v942_v16 = vld [vmem:[%s4653_s13 + $0xa8] sm:$0xff] }
  0xa7   : > { %v3458_v18 = vpop.permute.xlu0 %3457  ;;  %3154 = vmatpush1.bf16.msra.mxu1 %v3153_v15  ;;  %v717_v0 = vpop.permute.xlu1 %716  ;;  %v758_v29 = vsel %vm757_vm12, %v693_v3, %v708_v21  ;;  %v759_v32 = vsel %vm757_vm12, %v694_v4, %v709_v22  ;;  %v3172_v12 = vpack.c.bf16 %v940_v8, %v939_v7  ;;  %3169 = vmatprep.subr.bf16.mxu0 %v3168_v6  ;;  %v941_v15 = vld [vmem:[%s4653_s13 + $0xa0] sm:$0xff]  ;;  %v943_v21 = vld [vmem:[%s4653_s13 + $0xb0] sm:$0xff]  ;;  %v944_v22 = vld [vmem:[%s4653_s13 + $0xb8] sm:$0xff]  ;;  %vm998_vm9 = vcmask 146432  }
  0xa8   : > { %v3460_v19 = vunpack.i.h.bf16 %v3458_v18  ;;  %v3459_v20 = vunpack.i.l.bf16 %v3458_v18  ;;  %3171 = vmatpush3.bf16.msra.mxu0 %v3170_v10  ;;  %v3174_v17 = vpack.c.bf16 %v924_v14, %v923_v13  ;;  %v3664_v62 = vmov 3.0  }
  0xa9   : > { %3173 = vmatprep.subr.bf16.mxu0 %v3172_v12 }
  0xaa   : > { %v724_v23 = vsel %vm4632_vm11, %v3459_v20, %v3460_v19  ;;  %v723_v24 = vsel %vm4632_vm11, %v717_v0, %v3459_v20  ;;  %v764_v48 = vsel %vm761_vm13, %v760_v47, %v3460_v19  ;;  %v3176_v0 = vpack.c.bf16 %v942_v16, %v941_v15  ;;  %v925_v19 = vld [vmem:[%s4653_s13 + $0x20] sm:$0xff]  ;;  %v926_v20 = vld [vmem:[%s4653_s13 + $0x28] sm:$0xff] }
  0xab   : > { %v3463_v25 = vpop.permute.xlu0 %3462  ;;  %v729_v26 = vpop.permute.xlu1 %728  ;;  %v762_v33 = vsel %vm761_vm13, %v758_v29, %v723_v24  ;;  %v763_v37 = vsel %vm761_vm13, %v759_v32, %v724_v23  ;;  %v3178_v23 = vpack.c.bf16 %v926_v20, %v925_v19  ;;  %v3180_v24 = vpack.c.bf16 %v944_v22, %v943_v21  ;;  %v929_v32 = vld [vmem:[%s4653_s13 + $0x40] sm:$0xff] }
  0xac   : > { %v3465_v27 = vunpack.i.h.bf16 %v3463_v25  ;;  %v3464_v28 = vunpack.i.l.bf16 %v3463_v25  ;;  %3175 = vmatpush3.bf16.msra.mxu0 %v3174_v17  ;;  %v927_v25 = vld [vmem:[%s4653_s13 + $0x30] sm:$0xff] }
  0xad   : > { %3177 = vmatprep.subr.bf16.mxu0 %v3176_v0 }
  0xae   : > { %v735_v34 = vsel %vm4631_vm14, %v729_v26, %v3464_v28  ;;  %v736_v35 = vsel %vm4631_vm14, %v3464_v28, %v3465_v27  ;;  %v3165_v49 = vpack.c.bf16 %v3465_v27, %v764_v48  ;;  %v928_v26 = vld [vmem:[%s4653_s13 + $0x38] sm:$0xff]  ;;  %v945_v27 = vld [vmem:[%s4653_s13 + $0xc0] sm:$0xff]  ;;  %v946_v28 = vld [vmem:[%s4653_s13 + $0xc8] sm:$0xff] }
  0xaf   : > { %v3158_v39 = vpack.c.bf16 %v735_v34, %v762_v33  ;;  %v3155_v41 = vpack.c.bf16 %v736_v35, %v763_v37  ;;  %v3182_v29 = vpack.c.bf16 %v928_v26, %v927_v25  ;;  %v3184_v31 = vpack.c.bf16 %v946_v28, %v945_v27  ;;  %v930_v33 = vld [vmem:[%s4653_s13 + $0x48] sm:$0xff]  ;;  %v947_v34 = vld [vmem:[%s4653_s13 + $0xd0] sm:$0xff]  ;;  %v948_v35 = vld [vmem:[%s4653_s13 + $0xd8] sm:$0xff] }
  0xb0   : > { %3179 = vmatpush3.bf16.msra.mxu0 %v3178_v23  ;;  %v3186_v37 = vpack.c.bf16 %v930_v33, %v929_v32  ;;  %v3188_v38 = vpack.c.bf16 %v948_v35, %v947_v34  ;;  %v951_v48 = vld [vmem:[%s4653_s13 + $0xf0] sm:$0xff] }
  0xb1   : > { %3157 = vmatprep.subr.msk.bf16.mxu1 %vm3909_vm10, %v3155_v41  ;;  %3181 = vmatprep.subr.bf16.mxu0 %v3180_v24  ;;  %v932_v41 = vld [vmem:[%s4653_s13 + $0x58] sm:$0xff] }
  0xb2   : > { %3160 = vmatpush1.bf16.msk.msra.mxu1 %vm3909_vm10, %v3158_v39  ;;  %v931_v39 = vld [vmem:[%s4653_s13 + $0x50] sm:$0xff] }
  0xb3   : > { %3161 = vmatprep.subr.bf16.mxu1 %v3660_v36  ;;  %v3190_v45 = vpack.c.bf16 %v932_v41, %v931_v39 }
  0xb4   : > { %3183 = vmatpush3.bf16.msra.mxu0 %v3182_v29 }
  0xb5   : > { %2797 = vmatmul.mubr.msk.f32.vlgmr.msra.gmra.mrb[0].mxu1 %vm770_vm4, %v618_v43  ;;  %3185 = vmatprep.subr.bf16.mxu0 %v3184_v31 }
  0xb6   : > { %3163 = vmatpush3.bf16.msra.mxu1 %v3162_v46  ;;  %2972 = vmatprep.mubr.msk.f32.mxu1 %vm3661_vm6, %v3655_v30  ;;  %v934_v46 = vld [vmem:[%s4653_s13 + $0x68] sm:$0xff] }
  0xb7   : > { %3164 = vmatprep.subr.bf16.mxu1 %v3660_v36  ;;  %v3194_v47 = vpack.c.bf16 %v934_v46, %v933_v1  ;;  %v1346_v1 = vld [vmem:[%s4657_s14 + $0x10] sm:$0xff] }
  0xb8   : > { %3187 = vmatpush3.bf16.msra.mxu0 %v3186_v37 }
  0xb9   : > { %3189 = vmatprep.subr.bf16.mxu0 %v3188_v38 }
  0xba   : > { %3167 = vmatpush3.bf16.msk.msra.mxu1 %vm3909_vm10, %v3165_v49  ;;  %v952_v49 = vld [vmem:[%s4653_s13 + $0xf8] sm:$0xff]  ;;  %vm3201_vm10 = vmpackc.low %vm761_vm13, %vm3659_vm15 }
  0xbc   : > { %v768_v40 = vpop.permute.xlu0 %767  ;;  %3191 = vmatpush3.bf16.msra.mxu0 %v3190_v45  ;;  %v1344_v45 = vld [vmem:[%s4657_s14] sm:$0xff] }
  0xbd   : > { %2973 = vmatmul.mubr.msk.f32.vlgmr.msra.gmra.mrb[2].mxu1 %vm770_vm4, %v618_v43  ;;  %v3192_v43 = vpack.c.bf16 %v950_v44, %v949_v42  ;;  %vm1016_vm4 = vcmask 7168   ;;  %v1226_v44 = vld [vmem:[%s4656_s8 + $0x8] sm:$0xf] }
  0xbf   : > { %3193 = vmatprep.subr.bf16.mxu0 %v3192_v43  ;;  %v1345_v43 = vld [vmem:[%s4657_s14 + $0x8] sm:$0xff] }
  0xc0   : > { %3195 = vmatpush3.bf16.msra.mxu0 %v3194_v47  ;;  %v3223_v46 = vpack.c.bf16 %v1345_v43, %v1344_v45  ;;  %v1347_v47 = vld [vmem:[%s4657_s14 + $0x18] sm:$0xff] }
 0x188   : > { %v846_v50 = vpop.f32.mrb[0].mxu1 }
 0x189   : > { %v848_v51 = vpop.f32.mrb[1].mxu1  ;;  %v4001_v18 = vadd.f32 %v846_v50, %v768_v40  ;;  %v935_v50 = vld [vmem:[%s4653_s13 + $0x70] sm:$0xff] }
 0x18a   : > { %v3940_v52 = vadd.f32 %v848_v51, %v768_v40  ;;  %v936_v51 = vld [vmem:[%s4653_s13 + $0x78] sm:$0xff] }
 0x18c   : > { %960 = vrot.lane.b32.xlu1 %v3940_v52, %s4623_s3 }
 0x190   : > { %v917_v53 = vpop.f32.mrb[2].mxu1 }
 0x191   : > { %v3944_v54 = vadd.f32 %v917_v53, %v768_v40  ;;  %v2974_v55 = vpop.f32.mrb[3].mxu1  ;;  %v3196_v40 = vpack.c.bf16 %v952_v49, %v951_v48  ;;  %v3198_v53 = vpack.c.bf16 %v936_v51, %v935_v50  ;;  %v3226_v48 = vpack.c.bf16 %v1347_v47, %v1346_v1  ;;  %v1348_v49 = vld [vmem:[%s4657_s14 + $0x20] sm:$0xff]  ;;  %v1350_v51 = vld [vmem:[%s4657_s14 + $0x30] sm:$0xff] }
 0x192   : > { %v953_v55 = vld [vmem:[%s4653_s13 + $0x100] sm:$0xff] }
 0x193   : > { %962 = vrot.lane.b32.xlu1 %v3944_v54, %s4623_s3  ;;  %3197 = vmatprep.subr.bf16.mxu0 %v3196_v40  ;;  %v1349_v40 = vld [vmem:[%s4657_s14 + $0x28] sm:$0xff] }
 0x194   : > { %3199 = vmatpush3.bf16.msra.mxu0 %v3198_v53  ;;  %v3229_v50 = vpack.c.bf16 %v1349_v40, %v1348_v49  ;;  %v1351_v53 = vld [vmem:[%s4657_s14 + $0x38] sm:$0xff] }
 0x1fe   : > { %v3948_v56 = vpop.permute.xlu1 %960 }
 0x205   : > { %v963_v57 = vpop.permute.xlu1 %962 }
 0x206   : > { %v965_v58 = vsel %vm633_vm2, %v3948_v56, %v963_v57  ;;  %v971_v59 = vmax.f32 %v3944_v54, %v963_v57  ;;  %v954_v57 = vld [vmem:[%s4653_s13 + $0x108] sm:$0x1f]  ;;  %s4675_s13 = smov 117  }
 0x207   : > { %v970_v60 = vmax.f32 %v3940_v52, %v965_v58  ;;  %v3200_v58 = vpack.c.bf16 %v954_v57, %v953_v55  ;;  %v3232_v55 = vpack.c.bf16 %v1351_v53, %v1350_v51  ;;  %v1352_v57 = vld [vmem:[%s4657_s14 + $0x40] sm:$0x1f]  ;;  %s4676_s14 = smov 107  }
 0x208   : > { %979 = vrot.lane.b32.xlu1 %v971_v59, %s4612_s23 }
 0x209   : > { %977 = vrot.lane.b32.xlu0 %v970_v60, %s4612_s23  ;;  %3202 = vmatprep.subr.msk.bf16.mxu1 %vm3201_vm10, %v3200_v58 }
 0x20a   : > { %3205 = vmatpush3.bf16.msk.msra.mxu1 %vm3201_vm10, %v3200_v58 }
 0x27a   : > { %v980_v61 = vpop.permute.xlu1 %979 }
 0x27b   : > { %v3965_v3 = vmax.f32 %v971_v59, %v980_v61  ;;  %v3967_v4 = vpop.permute.xlu0 %977 }
 0x27c   : > { %v982_v9 = vsel %vm663_vm1, %v3967_v4, %v980_v61 }
 0x27d   : > { %v3980_v11 = vmax.f32 %v970_v60, %v982_v9  ;;  %996 = vrot.lane.b32.xlu1 %v3965_v3, %s4606_s20  ;;  %2979 = vmatprep.mubr.msk.f32.mxu1 %vm1063_vm7, %v3965_v3 }
 0x27f   : > { %994 = vrot.lane.b32.xlu0 %v3980_v11, %s4606_s20  ;;  %1136 = vmatprep.mubr.f32.mxu0 %v3980_v11  ;;  %s4655_s20 = smov 108  }
 0x281   : > { %1012 = vrot.lane.b32.xlu1 %v3980_v11, %s4608_s25 }
 0x283   : > { %958 = vrot.lane.b32.xlu0 %v4001_v18, %s4623_s3 }
 0x287   : > { %1014 = vrot.lane.b32.xlu0 %v3965_v3, %s4608_s25  ;;  %s4654_s25 = sld [smem:[#allocation4_spill]] }
 0x28d   : > { %v1224_v37 = vld [vmem:[%s4654_s25 + $0x8] sm:$0xf] }
 0x2ef   : > { %v997_v59 = vpop.permute.xlu1 %996 }
 0x2f1   : > { %v4083_v60 = vpop.permute.xlu0 %994 }
 0x2f2   : > { %v1000_v61 = vsel %vm998_vm9, %v4083_v60, %v997_v59 }
 0x2f3   : > { %vm1006_vm12 = vcmp.eq.f32.partialorder %v3944_v54, %v1000_v61  ;;  %v4094_v8 = vpop.permute.xlu1 %1012 }
 0x2f4   : > { %v1009_v63 = vsel %vm1006_vm12, 2.0, %v3664_v62  ;;  %vm1045_vm12 = vcmp.eq.f32.partialorder %v3944_v54, %v3965_v3  ;;  %v1225_v3 = vld [vmem:[%s4656_s8] sm:$0xff]  ;;  %s3679_s8 = smov 11  }
 0x2f5   : > { %1032 = vrot.lane.b32.xlu1 %v1009_v63, %s4622_s29  ;;  %v959_v2 = vpop.permute.xlu0 %958  ;;  %s4627_s29 = smov 121  }
 0x2f6   : > { %v964_v6 = vsel %vm633_vm2, %v959_v2, %v3948_v56 }
 0x2f7   : > { %v969_v5 = vmax.f32 %v4001_v18, %v964_v6 }
 0x2f9   : > { %975 = vrot.lane.b32.xlu0 %v969_v5, %s4612_s23  ;;  %v1015_v7 = vpop.permute.xlu0 %1014  ;;  %s4659_s23 = smov 127  }
 0x2fa   : > { %v1018_v9 = vsel %vm1016_vm4, %v4094_v8, %v1015_v7 }
 0x2fb   : > { %vm1024_vm10 = vcmp.eq.f32.partialorder %v3944_v54, %v1018_v9  ;;  %v1223_v54 = vld [vmem:[%s4654_s25] sm:$0xff] }
 0x367   : > { %v4098_v10 = vpop.permute.xlu1 %1032 }
 0x368   : > { %v1042_v12 = vsel %vm1024_vm10, 1.0, %v4098_v10  ;;  %vm1422_vm10 = vcmask 564224  }
 0x369   : > { %1053 = vrot.lane.b32.xlu1 %v1042_v12, %s4623_s3 }
 0x36b   : > { %v976_v56 = vpop.permute.xlu0 %975 }
 0x36c   : > { %v981_v13 = vsel %vm663_vm1, %v976_v56, %v3967_v4 }
 0x36d   : > { %v4105_v14 = vmax.f32 %v969_v5, %v981_v13 }
 0x36f   : > { %1137 = vmatmul.mubr.f32.vlgmr.msra.gmra.mrb[0].mxu0 %v4105_v14 }
 0x3db   : > { %v4110_v15 = vpop.permute.xlu1 %1053 }
 0x3dc   : > { %v1062_v16 = vsel %vm1045_vm12, 0.0, %v4110_v15 }
 0x3dd   : > { %2980 = vmatmul.mubr.msk.f32.vlgmr.msra.gmra.mrb[4].mxu1 %vm1063_vm7, %v1062_v16  ;;  %vm4625_vm7 = vcmask 588800  }
 0x3de   : > { %3000 = vmatprep.mubr.msk.f32.mxu1 %vm4625_vm7, %v1223_v54 }
 0x442   : > { %v2872_v17 = vpop.f32.mrb[0].mxu0 }
 0x443   : > { %v2873_v0 = vpop.f32.mrb[1].mxu0 }
 0x444   : > { %v2874_v19 = vadd.f32 %v2873_v0, %v2872_v17 }
 0x4b0   : > { %v4114_v20 = vpop.f32.mrb[4].mxu1 }
 0x4b1   : > { %v1213_v21 = vpop.f32.mrb[5].mxu1 }
 0x4b2   : > { %v1214_v4 = vadd.f32 %v2874_v19, %v1213_v21 }
 0x4b4   : > { %v1222_v22 = vmax.f32 %v1214_v4, 0.0 }
 0x4b6   : > { %1231 = vrot.lane.b32.xlu1 %v1222_v22, %s4620_s24  ;;  %1228 = vrot.lane.b32.xlu0 %v1222_v22, %s4623_s3  ;;  %s4660_s24 = smov 18  }
 0x4ba   : > { %1237 = vrot.lane.b32.xlu1 %v1222_v22, %s4614_s21  ;;  %1234 = vrot.lane.b32.xlu0 %v1222_v22, %s4626_s1  ;;  %s4663_s21 = smov 116  }
 0x4be   : > { %1243 = vrot.lane.b32.xlu1 %v1222_v22, %s4655_s20  ;;  %1240 = vrot.lane.b32.xlu0 %v1222_v22, %s4618_s2  ;;  %s4661_s2 = smov 111  }
 0x4c2   : > { %1249 = vrot.lane.b32.xlu1 %v1222_v22, %s4616_s27  ;;  %1246 = vrot.lane.b32.xlu0 %v1222_v22, %s4617_s28  ;;  %s4629_s27 = smov 119   ;;  %s4630_s28 = smov 122  }
 0x4c6   : > { %1254 = vperm.xlu0 %3466, %v1225_v3  }
 0x528   : > { %v1232_v23 = vpop.permute.xlu1 %1231  ;;  %v1229_v24 = vpop.permute.xlu0 %1228 }
 0x529   : > { %v3206_v25 = vpack.c.bf16 %v1229_v24, %v1222_v22 }
 0x52b   : > { %3207 = vmatprep.subr.bf16.mxu1 %v3206_v25 }
 0x52c   : > { %v1238_v26 = vpop.permute.xlu1 %1237  ;;  %3209 = vmatpush3.bf16.msra.mxu1 %v3206_v25  ;;  %v1235_v27 = vpop.permute.xlu0 %1234 }
 0x52d   : > { %v3210_v28 = vpack.c.bf16 %v1235_v27, %v1232_v23 }
 0x52f   : > { %3211 = vmatprep.subr.bf16.mxu1 %v3210_v28 }
 0x530   : > { %3213 = vmatpush3.bf16.msra.mxu1 %v3210_v28  ;;  %v1241_v29 = vpop.permute.xlu0 %1240  ;;  %v1244_v32 = vpop.permute.xlu1 %1243 }
 0x531   : > { %v3214_v31 = vpack.c.bf16 %v1241_v29, %v1238_v26 }
 0x533   : > { %3215 = vmatprep.subr.bf16.mxu1 %v3214_v31 }
 0x534   : > { %3217 = vmatpush3.bf16.msra.mxu1 %v3214_v31  ;;  %v1247_v33 = vpop.permute.xlu0 %1246  ;;  %v1250_v35 = vpop.permute.xlu1 %1249 }
 0x535   : > { %v3218_v34 = vpack.c.bf16 %v1247_v33, %v1244_v32 }
 0x537   : > { %3219 = vmatprep.subr.bf16.mxu1 %v3218_v34 }
 0x538   : > { %3221 = vmatpush3.bf16.msra.mxu1 %v3218_v34 }
 0x539   : > { %2998 = vmatprep.subr.mxu1 %v1250_v35 }
 0x53c   : > { %2999 = vmatpush3.msra.mxu1 %v1250_v35 }
 0x53d   : > { %3001 = vmatmul.mubr.msk.f32.vlgmr.msra.gmra.mrb[6].mxu1 %vm4625_vm7, %v1224_v37  ;;  %3222 = vmatprep.subr.bf16.mxu1 %v3660_v36 }
 0x53e   : > { %3021 = vmatprep.mubr.msk.f32.mxu1 %vm3661_vm6, %v3655_v30  ;;  %3224 = vmatpush3.bf16.msra.mxu1 %v3223_v46 }
 0x53f   : > { %3225 = vmatprep.subr.bf16.mxu1 %v3660_v36 }
 0x542   : > { %3227 = vmatpush3.bf16.msra.mxu1 %v3226_v48  ;;  %v1517_v48 = vld [vmem:[%s4664_s9] sm:$0xff] }
 0x543   : > { %3228 = vmatprep.subr.bf16.mxu1 %v3660_v36 }
 0x545   : > { %v1255_v39 = vpop.permute.xlu0 %1254 }
 0x546   : > { %3230 = vmatpush3.bf16.msra.mxu1 %v3229_v50 }
 0x547   : > { %3231 = vmatprep.subr.bf16.mxu1 %v3660_v36 }
 0x54a   : > { %3233 = vmatpush3.bf16.msra.mxu1 %v3232_v55 }
 0x54b   : > { %3019 = vmatprep.subr.mxu1 %v3655_v30 }
 0x54e   : > { %3020 = vmatpush3.msk.msra.mxu1 %vm761_vm13, %v1352_v57 }
 0x54f   : > { %3264 = vmatprep.subr.bf16.mxu1 %v3660_v36 }
 0x610   : > { %v3002_v38 = vpop.f32.mrb[6].mxu1 }
 0x611   : > { %v1335_v41 = vpop.f32.mrb[7].mxu1 }
 0x612   : > { %v1336_v42 = vadd.f32 %v1335_v41, %v1255_v39 }
 0x614   : > { %1355 = vrot.lane.b32.xlu1 %v1336_v42, %s4623_s3  ;;  %s4662_s3 = smov 126  }
 0x618   : > { %1259 = vperm.xlu1 %3467, %v1226_v44  }
 0x686   : > { %v1356_v58 = vpop.permute.xlu1 %1355 }
 0x687   : > { %v1361_v59 = vmax.f32 %v1336_v42, %v1356_v58 }
 0x689   : > { %1365 = vrot.lane.b32.xlu0 %v1361_v59, %s4626_s1 }
 0x697   : > { %v1260_v2 = vpop.permute.xlu1 %1259 }
 0x698   : > { %v4179_v6 = vadd.f32 %v3002_v38, %v1260_v2 }
 0x6fb   : > { %v1366_v61 = vpop.permute.xlu0 %1365 }
 0x6fc   : > { %v1371_v63 = vmax.f32 %v1361_v59, %v1366_v61 }
 0x6fe   : > { %1385 = vrot.lane.b32.xlu1 %v1371_v63, %s4658_s22  ;;  %1375 = vrot.lane.b32.xlu0 %v1371_v63, %s4633_s26 }
 0x6ff   : > { %3022 = vmatmul.mubr.msk.f32.vlgmr.msra.gmra.mrb[8].mxu1 %vm1422_vm10, %v1371_v63 }
 0x700   : > { %3024 = vmatprep.mubr.msk.f32.mxu1 %vm3661_vm6, %v3655_v30 }
 0x702   : > { %1357 = vrot.lane.b32.xlu0 %v4179_v6, %s4659_s23 }
 0x770   : > { %v1376_v5 = vpop.permute.xlu0 %1375  ;;  %v1386_v16 = vpop.permute.xlu1 %1385 }
 0x771   : > { %vm1381_vm13 = vcmp.eq.f32.partialorder %v1336_v42, %v1376_v5  ;;  %vm1391_vm12 = vcmp.eq.f32.partialorder %v1336_v42, %v1386_v16 }
 0x772   : > { %v1383_v7 = vsel %vm1381_vm13, 2.0, %v3664_v62  ;;  %vm1403_vm13 = vcmp.eq.f32.partialorder %v1336_v42, %v1371_v63 }
 0x773   : > { %1395 = vrot.lane.b32.xlu1 %v1383_v7, %s4629_s27  ;;  %s4665_s27 = sld [smem:[#allocation5_spill]] }
 0x774   : > { %v1358_v9 = vpop.permute.xlu0 %1357 }
 0x775   : > { %v1362_v12 = vmax.f32 %v4179_v6, %v1358_v9 }
 0x777   : > { %1367 = vrot.lane.b32.xlu1 %v1362_v12, %s4626_s1  ;;  %s4635_s1 = smov 115  }
 0x77b   : > { %1010 = vrot.lane.b32.xlu1 %v4105_v14, %s4658_s22 }
 0x7d2   : > { %v1499_v56 = vpop.f32.mrb[8].mxu1 }
 0x7d3   : > { %v3023_v13 = vpop.f32.mrb[9].mxu1  ;;  %v1513_v28 = vmax.f32 %v1499_v56, 0.0 }
 0x7d5   : > { %v1521_v34 = vrot.slane %v1513_v28, 4 }
 0x7e5   : > { %v1396_v17 = vpop.permute.xlu1 %1395 }
 0x7e6   : > { %v1401_v0 = vsel %vm1391_vm12, 1.0, %v1396_v17 }
 0x7e7   : > { %1407 = vrot.lane.b32.xlu0 %v1401_v0, %s4659_s23 }
 0x7e9   : > { %v1368_v19 = vpop.permute.xlu1 %1367 }
 0x7ea   : > { %v4196_v22 = vmax.f32 %v1362_v12, %v1368_v19 }
 0x7eb   : > { %992 = vrot.lane.b32.xlu0 %v4105_v14, %s4660_s24 }
 0x7ed   : > { %v1011_v37 = vpop.permute.xlu1 %1010 }
 0x7ee   : > { %v1017_v45 = vsel %vm1016_vm4, %v1011_v37, %v4094_v8 }
 0x7ef   : > { %vm1023_vm7 = vcmp.eq.f32.partialorder %v3940_v52, %v1017_v45 }
 0x859   : > { %v1408_v21 = vpop.permute.xlu0 %1407 }
 0x85a   : > { %v4194_v4 = vsel %vm1403_vm13, 0.0, %v1408_v21 }
 0x85b   : > { %v1417_v54 = vrot.slane %v4194_v4, 4 }
 0x85d   : > { %v993_v3 = vpop.permute.xlu0 %992  ;;  %v1421_v23 = vsel %vm749_vm8, %v4196_v22, %v1417_v54 }
 0x85e   : > { %v999_v24 = vsel %vm998_vm9, %v993_v3, %v4083_v60  ;;  %vm1004_vm12 = vcmp.eq.f32.partialorder %v4001_v18, %v993_v3  ;;  %3025 = vmatmul.mubr.msk.f32.gmra.mrb[10].mxu1 %vm1422_vm10, %v1421_v23 }
 0x85f   : > { %vm1005_vm13 = vcmp.eq.f32.partialorder %v3940_v52, %v999_v24  ;;  %v1007_v25 = vsel %vm1004_vm12, 2.0, %v3664_v62  ;;  %3027 = vmatprep.mubr.msk.f32.mxu1 %vm3661_vm6, %v3655_v30  ;;  %vm1034_vm12 = vcmask 908288  }
 0x860   : > { %v1008_v26 = vsel %vm1005_vm13, 2.0, %v3664_v62  ;;  %vm1022_vm13 = vcmp.eq.f32.partialorder %v4001_v18, %v1011_v37 }
 0x861   : > { %v3468_v27 = vpack.i.bf16 %v1007_v25, %v1008_v26 }
 0x863   : > { %3469 = vrot.lane.b32.xlu0 %v3468_v27, %s4661_s2  ;;  %s3675_s2 = smov 120  }
 0x8d5   : > { %v3470_v32 = vpop.permute.xlu0 %3469 }
 0x8d6   : > { %v3472_v38 = vunpack.i.h.bf16 %v3470_v32  ;;  %v3471_v39 = vunpack.i.l.bf16 %v3470_v32 }
 0x8d8   : > { %v1035_v43 = vsel %vm1034_vm12, %v3472_v38, %v3471_v39  ;;  %v1036_v1 = vsel %vm1034_vm12, %v3471_v39, %v4098_v10  ;;  %v1518_v10 = vld [vmem:[%s4664_s9 + $0x8] sm:$0xff]  ;;  %vm1043_vm12 = vcmp.eq.f32.partialorder %v4001_v18, %v4105_v14  ;;  %s4674_s9 = smov 118  }
 0x8d9   : > { %v1040_v46 = vsel %vm1022_vm13, 1.0, %v1035_v43  ;;  %v1041_v47 = vsel %vm1023_vm7, 1.0, %v1036_v1  ;;  %vm1044_vm7 = vcmp.eq.f32.partialorder %v3940_v52, %v3980_v11  ;;  %v1515_v52 = vld [vmem:[%s4665_s27] sm:$0xff]  ;;  %vm2802_vm14 = vmneg %vm1043_vm12  ;;  %v1516_v39 = vld [vmem:[%s4665_s27 + $0x8] sm:$0xff]  ;;  %vm1690_vm12 = vcmask 56320  }
 0x8da   : > { %v3508_v8 = vpack.i.bf16 %v1040_v46, %v1041_v47  ;;  %vm2800_vm13 = vmneg %vm1044_vm7  ;;  %vm1670_vm7 = vcmask 195584  }
 0x931   : > { %v4213_v29 = vpop.f32.mrb[10].mxu1 }
 0x932   : > { %v1514_v60 = vmax.f32 %v4213_v29, 0.0  ;;  %v3026_v31 = vpop.f32.mrb[11].mxu1 }
 0x934   : > { %v3478_v33 = vpack.i.bf16 %v1514_v60, %v1513_v28  ;;  %v1522_v35 = vrot.slane %v1514_v60, 4  ;;  %v3483_v44 = vpack.i.bf16 %v1513_v28, %v1514_v60 }
 0x936   : > { %3479 = vrot.lane.b32.xlu0 %v3478_v33, %s4662_s3  ;;  %v1523_v41 = vsel %vm749_vm8, %v1521_v34, %v1522_v35 }
 0x937   : > { %v3473_v42 = vpack.i.bf16 %v1523_v41, %v1521_v34 }
 0x939   : > { %3474 = vrot.lane.b32.xlu1 %v3473_v42, %s4659_s23 }
 0x93a   : > { %3484 = vrot.lane.b32.xlu0 %v3483_v44, %s4627_s29  ;;  %s4666_s29 = smov 119  }
 0x93d   : > { %3489 = vrot.lane.b32.xlu1 %v3473_v42, %s4630_s28  ;;  %s4636_s28 = smov 114  }
 0x93e   : > { %3499 = vrot.lane.b32.xlu0 %v3478_v33, %s4663_s21 }
 0x941   : > { %3494 = vrot.lane.b32.xlu1 %v3473_v42, %s3675_s2 }
 0x942   : > { %3509 = vrot.lane.b32.xlu0 %v3508_v8, %s4659_s23 }
 0x945   : > { %3504 = vrot.lane.b32.xlu1 %v3473_v42, %s4635_s1  ;;  %s3678_s1 = smov 7  }
 0x946   : > { %1377 = vrot.lane.b32.xlu0 %v4196_v22, %s4633_s26 }
 0x949   : > { %3514 = vrot.lane.b32.xlu1 %v3478_v33, %s4636_s28  ;;  %s4670_s28 = smov 122  }
 0x94a   : > { %1582 = vperm.xlu0 %3466, %v1518_v10  }
 0x94d   : > { %1577 = vperm.xlu1 %3467, %v1517_v48  }
 0x951   : > { %1387 = vrot.lane.b32.xlu1 %v4196_v22, %s4658_s22 }
 0x9a8   : > { %v3480_v49 = vpop.permute.xlu0 %3479 }
 0x9a9   : > { %v3481_v57 = vunpack.i.l.bf16 %v3480_v49  ;;  %v3482_v61 = vunpack.i.h.bf16 %v3480_v49 }
 0x9ab   : > { %v3475_v40 = vpop.permute.xlu1 %3474 }
 0x9ac   : > { %v3476_v50 = vunpack.i.l.bf16 %v3475_v40  ;;  %v3485_v51 = vpop.permute.xlu0 %3484  ;;  %v3477_v53 = vunpack.i.h.bf16 %v3475_v40 }
 0x9ad   : > { %v3486_v56 = vunpack.i.l.bf16 %v3485_v51  ;;  %v3487_v3 = vunpack.i.h.bf16 %v3485_v51 }
 0x9ae   : > { %v1571_v55 = vsel %vm749_vm8, %v1514_v60, %v3476_v50  ;;  %v3238_v5 = vpack.c.bf16 %v3481_v57, %v3477_v53  ;;  %v2816_v50 = vld [vmem:[%s4591_s17] ss:$0 sm:$0xff] }
 0x9af   : > { %v3490_v58 = vpop.permute.xlu1 %3489  ;;  %v3234_v59 = vpack.c.bf16 %v1571_v55, %v1513_v28 }
 0x9b0   : > { %v3491_v63 = vunpack.i.l.bf16 %v3490_v58  ;;  %v3500_v2 = vpop.permute.xlu0 %3499  ;;  %v3492_v7 = vunpack.i.h.bf16 %v3490_v58 }
 0x9b1   : > { %3235 = vmatprep.subr.bf16.mxu0 %v3234_v59  ;;  %v3502_v28 = vunpack.i.h.bf16 %v3500_v2 }
 0x9b2   : > { %v1572_v9 = vsel %vm749_vm8, %v3482_v61, %v3491_v63  ;;  %3237 = vmatpush3.bf16.msra.mxu0 %v3234_v59 }
 0x9b3   : > { %v3495_v12 = vpop.permute.xlu1 %3494  ;;  %3239 = vmatprep.subr.bf16.mxu0 %v3238_v5  ;;  %v3242_v17 = vpack.c.bf16 %v3492_v7, %v1572_v9 }
 0x9b4   : > { %v3496_v13 = vunpack.i.l.bf16 %v3495_v12  ;;  %v3510_v16 = vpop.permute.xlu0 %3509  ;;  %v3497_v18 = vunpack.i.h.bf16 %v3495_v12 }
 0x9b5   : > { %v3512_v0 = vunpack.i.h.bf16 %v3510_v16  ;;  %v3511_v19 = vunpack.i.l.bf16 %v3510_v16  ;;  %v1697_v16 = vld [vmem:[%s4578_s4 + $0x8] sm:$0xff] }
 0x9b6   : > { %3241 = vmatpush3.bf16.msra.mxu0 %v3238_v5  ;;  %v1573_v21 = vsel %vm749_vm8, %v3486_v56, %v3496_v13  ;;  %v1701_v56 = vld [vmem:[%s4584_s10 + $0x8] sm:$0xf]  ;;  %v1700_v13 = vld [vmem:[%s4584_s10] sm:$0xff] }
 0x9b7   : > { %v3505_v23 = vpop.permute.xlu1 %3504  ;;  %3243 = vmatprep.subr.bf16.mxu0 %v3242_v17  ;;  %v1056_v24 = vsel %vm633_vm2, %v3511_v19, %v4110_v15  ;;  %v1055_v25 = vsel %vm633_vm2, %v3512_v0, %v3511_v19  ;;  %v3246_v14 = vpack.c.bf16 %v1573_v21, %v3487_v3  ;;  %v3501_v15 = vunpack.i.l.bf16 %v3500_v2  ;;  %v1845_v0 = vld [vmem:[%s4589_s15 + $0x8] sm:$0xff] }
 0x9b8   : > { %v1378_v11 = vpop.permute.xlu0 %1377  ;;  %2801 = vmatprep.mubr.msk.f32.mxu0 %vm2800_vm13, %v1056_v24  ;;  %v3506_v26 = vunpack.i.l.bf16 %v3505_v23  ;;  %v3507_v31 = vunpack.i.h.bf16 %v3505_v23  ;;  %vm1693_vm13 = vcmask 252928  }
 0x9b9   : > { %vm1382_vm11 = vcmp.eq.f32.partialorder %v4179_v6, %v1378_v11  ;;  %2803 = vmatmul.mubr.msk.f32.gmra.mrb[2].mxu0 %vm2802_vm14, %v1055_v25  ;;  %v3250_v60 = vpack.c.bf16 %v3501_v15, %v3497_v18 }
 0x9ba   : > { %v1384_v27 = vsel %vm1382_vm11, 2.0, %v3664_v62  ;;  %3245 = vmatpush3.bf16.msra.mxu0 %v3242_v17  ;;  %3058 = vmatprep.mubr.msk.f32.mxu0 %vm692_vm5, %v1515_v52  ;;  %v1574_v32 = vsel %vm749_vm8, %v3502_v28, %v3506_v26  ;;  %vm4261_vm11 = vmpackc.low %vm749_vm8, %vm3659_vm15  ;;  %vm1404_vm15 = vcmp.eq.f32.partialorder %v4179_v6, %v4196_v22  ;;  %v1844_v17 = vld [vmem:[%s4589_s15] sm:$0xff] }
 0x9bb   : > { %1397 = vrot.lane.b32.xlu0 %v1384_v27, %s4666_s29  ;;  %3247 = vmatprep.subr.bf16.mxu0 %v3246_v14  ;;  %v3515_v33 = vpop.permute.xlu1 %3514  ;;  %v3254_v34 = vpack.c.bf16 %v3507_v31, %v1574_v32  ;;  %s2834_s29 = sshll.u32 %s4697_s30, 4  ;;  %v3293_v19 = vpack.c.bf16 %v1845_v0, %v1844_v17 }
 0x9bc   : > { %v3517_v35 = vunpack.i.h.bf16 %v3515_v33  ;;  %v3516_v37 = vunpack.i.l.bf16 %v3515_v33  ;;  %s615_s26 = scalar_lea.vmem %s4593_s19, %s2834_s29  ;;  %s4671_s29 = smov 114  }
 0x9be   : > { %3249 = vmatpush3.bf16.msra.mxu0 %v3246_v14  ;;  %v3258_v38 = vpack.c.bf16 %v3517_v35, %v3516_v37 }
 0x9bf   : > { %3251 = vmatprep.subr.bf16.mxu0 %v3250_v60 }
 0x9c2   : > { %3253 = vmatpush3.bf16.msra.mxu0 %v3250_v60 }
 0x9c3   : > { %3255 = vmatprep.subr.bf16.mxu0 %v3254_v34 }
 0x9c6   : > { %3257 = vmatpush3.bf16.msra.mxu0 %v3254_v34 }
 0x9c7   : > { %3260 = vmatprep.subr.msk.bf16.mxu0 %vm4261_vm11, %v3258_v38 }
 0x9c9   : > { %v1583_v42 = vpop.permute.xlu0 %1582 }
 0x9ca   : > { %3263 = vmatpush3.bf16.msk.msra.mxu0 %vm4261_vm11, %v3258_v38 }
 0x9cb   : > { %3292 = vmatprep.subr.bf16.mxu0 %v3660_v36 }
 0x9cc   : > { %v1578_v41 = vpop.permute.xlu1 %1577 }
 0x9cd   : > { %3059 = vmatmul.mubr.msk.f32.vlgmr.msra.gmra.mrb[4].mxu0 %vm692_vm5, %v1516_v39 }
 0x9ce   : > { %3067 = vmatprep.mubr.msk.f32.mxu0 %vm3661_vm6, %v3655_v30  ;;  %3294 = vmatpush3.bf16.msra.mxu0 %v3293_v19 }
 0x9cf   : > { %3065 = vmatprep.subr.mxu0 %v3655_v30 }
 0x9d0   : > { %v1388_v44 = vpop.permute.xlu1 %1387 }
 0x9d1   : > { %vm1392_vm14 = vcmp.eq.f32.partialorder %v4179_v6, %v1388_v44 }
 0xa2d   : > { %v1398_v45 = vpop.permute.xlu0 %1397 }
 0xa2e   : > { %v1402_v43 = vsel %vm1392_vm14, 1.0, %v1398_v45  ;;  %vm3266_vm14 = vmpackc.low %vm1693_vm13, %vm1693_vm13 }
 0xa2f   : > { %1409 = vrot.lane.b32.xlu0 %v1402_v43, %s4659_s23 }
 0xa8c   : > { %v2875_v1 = vpop.f32.mrb[2].mxu0 }
 0xa8d   : > { %v2876_v46 = vpop.f32.mrb[3].mxu0 }
 0xa8e   : > { %v2877_v47 = vadd.f32 %v2876_v46, %v2875_v1 }
 0xa90   : > { %v4279_v8 = vadd.f32 %v4114_v20, %v2877_v47 }
 0xaa0   : > { %v3060_v10 = vpop.f32.mrb[4].mxu0 }
 0xaa1   : > { %v1665_v48 = vadd.f32 %v3060_v10, %v1583_v42  ;;  %v1410_v49 = vpop.permute.xlu0 %1409  ;;  %v1659_v40 = vpop.f32.mrb[5].mxu0 }
 0xaa2   : > { %v1414_v51 = vsel %vm1404_vm15, 0.0, %v1410_v49  ;;  %v1660_v20 = vadd.f32 %v1659_v40, %v1578_v41  ;;  %v1696_v40 = vld [vmem:[%s4578_s4] sm:$0xff] }
 0xaa3   : > { %v1669_v53 = vmax.f32 %v1665_v48, 0.0  ;;  %v1418_v55 = vrot.slane %v1414_v51, 4  ;;  %v1698_v51 = vld [vmem:[%s4578_s4 + $0x10] sm:$0xf] }
 0xaa4   : > { %v1668_v57 = vmax.f32 %v1660_v20, 0.0  ;;  %v1846_v20 = vld [vmem:[%s4589_s15 + $0x10] sm:$0xff] }
 0xaa5   : > { %1672 = vst.msk [vmem:[%s615_s26 + $0x8] sm:$0xff] %vm1670_vm7, %v1669_v53  ;;  %v1681_v58 = vmul.f32 %v2816_v50, %v1669_v53  ;;  %v1419_v6 = vsel %vm749_vm8, %v1417_v54, %v1418_v55  ;;  %3066 = vmatpush3.msra.mxu0 %v1846_v20 }
 0xaa6   : > { %1671 = vst.msk [vmem:[%s615_s26] sm:$0xff] %vm1670_vm7, %v1668_v57  ;;  %v1680_v22 = vmul.f32 %v2816_v50, %v1668_v57  ;;  %3028 = vmatmul.mubr.msk.f32.gmra.mrb[12].mxu1 %vm1422_vm10, %v1419_v6  ;;  %s4669_s26 = smov 121   ;;  %vm1762_vm10 = vcmask 130048   ;;  %v1699_v50 = vld [vmem:[%s4578_s4 + $0x18] sm:$0xf]  ;;  %3295 = vmatprep.subr.bf16.mxu0 %v3660_v36 }
 0xaa7   : > { %2819 = vmatprep.mubr.msk.f32.mxu1 %vm1762_vm10, %v1697_v16 }
 0xaa8   : > { %v3518_v59 = vpack.i.bf16 %v1681_v58, %v1680_v22 }
 0xaaa   : > { %3519 = vrot.lane.b32.xlu1 %v3518_v59, %s3678_s1  ;;  %s4680_s1 = smov 92  }
 0xb1c   : > { %v3520_v61 = vpop.permute.xlu1 %3519 }
 0xb1d   : > { %v3522_v63 = vunpack.i.h.bf16 %v3520_v61  ;;  %v3521_v2 = vunpack.i.l.bf16 %v3520_v61 }
 0xb1f   : > { %v1692_v5 = vsel %vm1690_vm12, 0.0, %v3522_v63  ;;  %v1691_v7 = vsel %vm1690_vm12, 0.0, %v3521_v2 }
 0xb20   : > { %v1695_v9 = vsel %vm1693_vm13, %v1692_v5, 0.0  ;;  %v1694_v4 = vsel %vm1693_vm13, %v1691_v7, 0.0  ;;  %v3265_v12 = vpack.c.bf16 %v1692_v5, %v1691_v7 }
 0xb21   : > { %v3528_v54 = vpack.i.bf16 %v1695_v9, %v1694_v4 }
 0xb22   : > { %3267 = vmatpush1.bf16.msk.msra.mxu1 %vm3266_vm14, %v3265_v12 }
 0xb23   : > { %3529 = vrot.lane.b32.xlu0 %v3528_v54, %s4662_s3  ;;  %3524 = vrot.lane.b32.xlu1 %v3528_v54, %s4659_s23 }
 0xb24   : > { %3268 = vmatprep.subr.bf16.mxu1 %v3660_v36 }
 0xb27   : > { %3539 = vrot.lane.b32.xlu0 %v3528_v54, %s4669_s26  ;;  %3534 = vrot.lane.b32.xlu1 %v3528_v54, %s4670_s28  ;;  %s4677_s28 = smov 106  }
 0xb2b   : > { %3549 = vrot.lane.b32.xlu0 %v3528_v54, %s4663_s21  ;;  %3544 = vrot.lane.b32.xlu1 %v3528_v54, %s3675_s2 }
 0xb2f   : > { %3559 = vrot.lane.b32.xlu0 %v3528_v54, %s4671_s29  ;;  %3554 = vrot.lane.b32.xlu1 %v3528_v54, %s4672_s7  ;;  %s4673_s7 = smov 10  }
 0xb33   : > { %1759 = vperm.xlu0 %3466, %v1701_v56   ;;  %1754 = vperm.xlu1 %3467, %v1700_v13  }
 0xb37   : > { %1849 = vrot.lane.b32.xlu1 %v4213_v29, %s4669_s26 }
 0xb79   : > { %v1509_v21 = vpop.f32.mrb[12].mxu1 }
 0xb7a   : > { %v3029_v3 = vpop.f32.mrb[13].mxu1  ;;  %1851 = vrot.lane.b32.xlu0 %v1509_v21, %s4669_s26  ;;  %s3680_s26 = smov 19  }
 0xb95   : > { %v3530_v23 = vpop.permute.xlu0 %3529  ;;  %v3525_v29 = vpop.permute.xlu1 %3524 }
 0xb96   : > { %v3527_v24 = vunpack.i.h.bf16 %v3525_v29  ;;  %v3526_v25 = vunpack.i.l.bf16 %v3525_v29  ;;  %v3532_v52 = vunpack.i.h.bf16 %v3530_v23  ;;  %v3531_v11 = vunpack.i.l.bf16 %v3530_v23 }
 0xb98   : > { %v3269_v18 = vpack.c.bf16 %v3527_v24, %v3526_v25  ;;  %v3272_v26 = vpack.c.bf16 %v3532_v52, %v3531_v11 }
 0xb99   : > { %v3535_v14 = vpop.permute.xlu1 %3534  ;;  %v3540_v28 = vpop.permute.xlu0 %3539 }
 0xb9a   : > { %3270 = vmatpush1.bf16.msra.mxu1 %v3269_v18  ;;  %v3537_v27 = vunpack.i.h.bf16 %v3535_v14  ;;  %v3536_v15 = vunpack.i.l.bf16 %v3535_v14  ;;  %v3542_v60 = vunpack.i.h.bf16 %v3540_v28  ;;  %v3541_v31 = vunpack.i.l.bf16 %v3540_v28 }
 0xb9b   : > { %3271 = vmatprep.subr.bf16.mxu1 %v3660_v36 }
 0xb9c   : > { %v3275_v32 = vpack.c.bf16 %v3537_v27, %v3536_v15  ;;  %v3278_v34 = vpack.c.bf16 %v3542_v60, %v3541_v31 }
 0xb9d   : > { %v3545_v33 = vpop.permute.xlu1 %3544  ;;  %v3550_v38 = vpop.permute.xlu0 %3549 }
 0xb9e   : > { %3273 = vmatpush1.bf16.msra.mxu1 %v3272_v26  ;;  %v3547_v35 = vunpack.i.h.bf16 %v3545_v33  ;;  %v3546_v37 = vunpack.i.l.bf16 %v3545_v33  ;;  %v3552_v39 = vunpack.i.h.bf16 %v3550_v38  ;;  %v3551_v41 = vunpack.i.l.bf16 %v3550_v38 }
 0xb9f   : > { %3274 = vmatprep.subr.bf16.mxu1 %v3660_v36 }
 0xba0   : > { %v3281_v42 = vpack.c.bf16 %v3547_v35, %v3546_v37  ;;  %v3284_v45 = vpack.c.bf16 %v3552_v39, %v3551_v41 }
 0xba1   : > { %v3555_v44 = vpop.permute.xlu1 %3554  ;;  %v3560_v46 = vpop.permute.xlu0 %3559 }
 0xba2   : > { %3276 = vmatpush1.bf16.msra.mxu1 %v3275_v32  ;;  %v3557_v43 = vunpack.i.h.bf16 %v3555_v44  ;;  %v3556_v1 = vunpack.i.l.bf16 %v3555_v44  ;;  %v3562_v47 = vunpack.i.h.bf16 %v3560_v46  ;;  %v3561_v10 = vunpack.i.l.bf16 %v3560_v46 }
 0xba3   : > { %3277 = vmatprep.subr.bf16.mxu1 %v3660_v36 }
 0xba4   : > { %v3287_v48 = vpack.c.bf16 %v3557_v43, %v3556_v1  ;;  %v3290_v49 = vpack.c.bf16 %v3562_v47, %v3561_v10 }
 0xba6   : > { %3279 = vmatpush1.bf16.msra.mxu1 %v3278_v34 }
 0xba7   : > { %3280 = vmatprep.subr.bf16.mxu1 %v3660_v36 }
 0xbaa   : > { %3282 = vmatpush1.bf16.msra.mxu1 %v3281_v42 }
 0xbab   : > { %3283 = vmatprep.subr.bf16.mxu1 %v3660_v36 }
 0xbae   : > { %3285 = vmatpush1.bf16.msra.mxu1 %v3284_v45 }
 0xbaf   : > { %3286 = vmatprep.subr.bf16.mxu1 %v3660_v36 }
 0xbb2   : > { %3288 = vmatpush1.bf16.msra.mxu1 %v3287_v48  ;;  %v1755_v53 = vpop.permute.xlu1 %1754  ;;  %v1760_v6 = vpop.permute.xlu0 %1759 }
 0xbb3   : > { %3289 = vmatprep.subr.bf16.mxu1 %v3660_v36 }
 0xbb6   : > { %3291 = vmatpush1.bf16.msra.mxu1 %v3290_v49  ;;  %v1850_v63 = vpop.permute.xlu1 %1849 }
 0xbb9   : > { %1834 = vmatmul.mubr.f32.vlgmr.msra.gmra.mrb[14].mxu1 %v1696_v40 }
 0xbba   : > { %2820 = vmatprep.mubr.msk.f32.mxu1 %vm1762_vm10, %v1699_v50 }
 0xbbd   : > { %1839 = vmatmul.mubr.f32.gmra.mrb[16].mxu1 %v1698_v51 }
 0xbbe   : > { %2279 = vmatprep.mubr.f32.mxu1 %v3655_v30 }
 0xbec   : > { %v1852_v5 = vpop.permute.xlu0 %1851 }
 0xc8c   : > { %v1835_v55 = vpop.f32.mrb[14].mxu1 }
 0xc8d   : > { %v1836_v57 = vadd.f32 %v1835_v55, %v1755_v53  ;;  %v1837_v58 = vpop.f32.mrb[15].mxu1 }
 0xc8f   : > { %3068 = vmatmul.mubr.msk.f32.vlgmr.msra.gmra.mrb[6].mxu0 %vm1670_vm7, %v1836_v57 }
 0xc90   : > { %v1840_v22 = vpop.f32.mrb[16].mxu1  ;;  %3070 = vmatprep.mubr.msk.f32.mxu0 %vm3661_vm6, %v3655_v30 }
 0xc91   : > { %v1841_v59 = vadd.f32 %v1840_v22, %v1760_v6  ;;  %v1842_v61 = vpop.f32.mrb[17].mxu1 }
 0xc93   : > { %v1854_v2 = vsel %vm749_vm8, %v1841_v59, %v1850_v63 }
 0xc94   : > { %3071 = vmatmul.mubr.msk.f32.gmra.mrb[8].mxu0 %vm1670_vm7, %v1854_v2 }
 0xc95   : > { %3073 = vmatprep.mubr.msk.f32.mxu0 %vm3661_vm6, %v3655_v30 }
 0xc98   : > { %3074 = vmatmul.mubr.msk.f32.gmra.mrb[10].mxu0 %vm1670_vm7, %v1852_v5 }
 0xc99   : > { %3104 = vmatprep.mubr.msk.f32.mxu0 %vm3661_vm6, %v3655_v30 }
 0xd62   : > { %v1929_v7 = vpop.f32.mrb[6].mxu0 }
 0xd63   : > { %v3069_v9 = vpop.f32.mrb[7].mxu0  ;;  %v1947_v4 = vrot.slane %v1929_v7, 4 }
 0xd64   : > { %v2037_v9 = vld [vmem:[%s4585_s11] sm:$0xff] }
 0xd67   : > { %v1934_v12 = vpop.f32.mrb[8].mxu0 }
 0xd68   : > { %v1948_v54 = vrot.slane %v1934_v12, 4  ;;  %v3072_v56 = vpop.f32.mrb[9].mxu0  ;;  %vm1954_vm15 = vcmp.eq.f32.partialorder %v1934_v12, 1.0  ;;  %vm1980_vm12 = vcmp.eq.f32.partialorder %v1934_v12, 2.0  ;;  %vm2007_vm13 = vcmp.eq.f32.partialorder %v1934_v12, 3.0 }
 0xd69   : > { %v1956_v13 = vsel %vm1954_vm15, %v1947_v4, 0.0  ;;  %v1982_v16 = vsel %vm1980_vm12, %v1947_v4, 0.0  ;;  %v2009_v17 = vsel %vm2007_vm13, %v1947_v4, 0.0  ;;  %vm1943_vm14 = vcmp.eq.f32.partialorder %v1934_v12, 0.0  ;;  %v2180_v12 = vld [vmem:[%s4590_s16 + $0x20] sm:$0xff] }
 0xd6a   : > { %v1949_v0 = vsel %vm749_vm8, %v1947_v4, %v1948_v54  ;;  %v1960_v21 = vrot.slane %v1956_v13, 4  ;;  %v1986_v3 = vrot.slane %v1982_v16, 4  ;;  %v1952_v23 = vsel %vm1943_vm14, %v1947_v4, 0.0  ;;  %v2177_v4 = vld [vmem:[%s4590_s16 + $0x8] sm:$0xff]  ;;  %v2176_v54 = vld [vmem:[%s4590_s16] sm:$0xff]  ;;  %v2179_v13 = vld [vmem:[%s4590_s16 + $0x18] sm:$0xff] }
 0xd6b   : > { %v1939_v19 = vpop.f32.mrb[10].mxu0  ;;  %v2013_v27 = vrot.slane %v2009_v17, 4  ;;  %v3317_v56 = vpack.c.bf16 %v2180_v12, %v2177_v4  ;;  %v3319_v16 = vpack.c.bf16 %v2179_v13, %v2176_v54  ;;  %v2186_v17 = vld [vmem:[%s4590_s16 + $0x50] sm:$0xff]  ;;  %v2181_v12 = vld [vmem:[%s4590_s16 + $0x28] sm:$0xff]  ;;  %v2184_v13 = vld [vmem:[%s4590_s16 + $0x40] sm:$0xff] }
 0xd6c   : > { %vm1944_vm7 = vcmp.eq.f32.partialorder %v1939_v19, 0.0  ;;  %v3075_v29 = vpop.f32.mrb[11].mxu0  ;;  %vm1955_vm10 = vcmp.eq.f32.partialorder %v1939_v19, 1.0  ;;  %vm1981_vm0 = vcmp.eq.f32.partialorder %v1939_v19, 2.0  ;;  %vm2008_vm3 = vcmp.eq.f32.partialorder %v1939_v19, 3.0  ;;  %v2178_v4 = vld [vmem:[%s4590_s16 + $0x10] sm:$0xff] }
 0xd6d   : > { %v1953_v24 = vsel %vm1944_vm7, %v1949_v0, 0.0  ;;  %v1957_v25 = vsel %vm1955_vm10, %v1949_v0, 0.0  ;;  %v1983_v52 = vsel %vm1981_vm0, %v1949_v0, 0.0  ;;  %v2010_v11 = vsel %vm2008_vm3, %v1949_v0, 0.0  ;;  %v2182_v0 = vld [vmem:[%s4590_s16 + $0x30] sm:$0xff]  ;;  %3318 = vmatprep.subr.bf16.mxu1 %v3317_v56  ;;  %v2192_v29 = vld [vmem:[%s4590_s16 + $0x80] sm:$0xff] }
 0xd6e   : > { %v1961_v18 = vrot.slane %v1957_v25, 4  ;;  %v1987_v14 = vrot.slane %v1983_v52, 4  ;;  %v2014_v26 = vrot.slane %v2010_v11, 4  ;;  %vm1995_vm0 = vcmask 80896   ;;  %3320 = vmatpush1.bf16.msra.mxu1 %v3319_v16  ;;  %v2191_v52 = vld [vmem:[%s4590_s16 + $0x78] sm:$0xff] }
 0xd6f   : > { %vm2022_vm3 = vcmask 89088   ;;  %v3337_v54 = vpack.c.bf16 %v2181_v12, %v2178_v4  ;;  %v2187_v16 = vld [vmem:[%s4590_s16 + $0x58] sm:$0xff] }
 0xd70   : > { %1965 = vrot.lane.b32.xlu0 %v1961_v18, %s4658_s22  ;;  %v1962_v15 = vsel %vm749_vm8, %v1960_v21, %v1961_v18  ;;  %v1988_v28 = vsel %vm749_vm8, %v1986_v3, %v1987_v14  ;;  %v2015_v60 = vsel %vm749_vm8, %v2013_v27, %v2014_v26  ;;  %v2185_v21 = vld [vmem:[%s4590_s16 + $0x48] sm:$0xff]  ;;  %v2195_v18 = vld [vmem:[%s4590_s16 + $0x98] sm:$0xff] }
 0xd71   : > { %1963 = vrot.lane.b32.xlu1 %v1962_v15, %s4658_s22  ;;  %v3323_v3 = vpack.c.bf16 %v2185_v21, %v2182_v0  ;;  %v2197_v15 = vld [vmem:[%s4590_s16 + $0xa8] sm:$0xff]  ;;  %v2190_v0 = vld [vmem:[%s4590_s16 + $0x70] sm:$0xff]  ;;  %v2196_v21 = vld [vmem:[%s4590_s16 + $0xa0] sm:$0xff] }
 0xd74   : > { %1991 = vrot.lane.b32.xlu0 %v1987_v14, %s4673_s7  ;;  %v2198_v14 = vld [vmem:[%s4590_s16 + $0xb0] sm:$0xff] }
 0xd75   : > { %1989 = vrot.lane.b32.xlu1 %v1988_v28, %s4673_s7  ;;  %v3329_v27 = vpack.c.bf16 %v2198_v14, %v2195_v18 }
 0xd78   : > { %2018 = vrot.lane.b32.xlu0 %v2014_v26, %s3679_s8  ;;  %v2194_v26 = vld [vmem:[%s4590_s16 + $0x90] sm:$0xff] }
 0xd79   : > { %2016 = vrot.lane.b32.xlu1 %v2015_v60, %s3679_s8  ;;  %v3331_v28 = vpack.c.bf16 %v2197_v15, %v2194_v26  ;;  %v2201_v60 = vld [vmem:[%s4590_s16 + $0xc8] sm:$0xff] }
 0xde2   : > { %v1966_v31 = vpop.permute.xlu0 %1965 }
 0xde3   : > { %v1970_v32 = vsel %vm1016_vm4, 0.0, %v1966_v31  ;;  %v1964_v33 = vpop.permute.xlu1 %1963  ;;  %v2204_v31 = vld [vmem:[%s4590_s16 + $0xe0] sm:$0xff] }
 0xde4   : > { %v1969_v34 = vsel %vm1016_vm4, 0.0, %v1964_v33  ;;  %v1974_v35 = vrot.slane %v1970_v32, 4  ;;  %v3333_v32 = vpack.c.bf16 %v2204_v31, %v2201_v60 }
 0xde5   : > { %v1973_v37 = vrot.slane %v1969_v34, 4 }
 0xde6   : > { %v1992_v38 = vpop.permute.xlu0 %1991 }
 0xde7   : > { %v1997_v39 = vsel %vm1995_vm0, 0.0, %v1992_v38  ;;  %v1990_v41 = vpop.permute.xlu1 %1989  ;;  %v1975_v45 = vsel %vm749_vm8, %v1973_v37, %v1974_v35  ;;  %v1978_v46 = vadd.f32 %v1973_v37, %v1952_v23  ;;  %v2189_v23 = vld [vmem:[%s4590_s16 + $0x68] sm:$0xff] }
 0xde8   : > { %v2001_v42 = vrot.slane %v1997_v39, 4  ;;  %v1996_v44 = vsel %vm1995_vm0, 0.0, %v1990_v41  ;;  %v1979_v49 = vadd.f32 %v1975_v45, %v1953_v24  ;;  %v2188_v24 = vld [vmem:[%s4590_s16 + $0x60] sm:$0xff]  ;;  %v3325_v25 = vpack.c.bf16 %v2192_v29, %v2189_v23 }
 0xde9   : > { %v2000_v43 = vrot.slane %v1996_v44, 4  ;;  %v3327_v11 = vpack.c.bf16 %v2191_v52, %v2188_v24  ;;  %v2200_v29 = vld [vmem:[%s4590_s16 + $0xc0] sm:$0xff]  ;;  %v2203_v24 = vld [vmem:[%s4590_s16 + $0xd8] sm:$0xff] }
 0xdea   : > { %v2019_v1 = vpop.permute.xlu0 %2018  ;;  %v3335_v52 = vpack.c.bf16 %v2203_v24, %v2200_v29 }
 0xdeb   : > { %v2002_v47 = vsel %vm749_vm8, %v2000_v43, %v2001_v42  ;;  %v2024_v10 = vsel %vm2022_vm3, 0.0, %v2019_v1  ;;  %v2017_v48 = vpop.permute.xlu1 %2016  ;;  %v2005_v51 = vadd.f32 %v2000_v43, %v1978_v46 }
 0xdec   : > { %v2028_v40 = vrot.slane %v2024_v10, 4  ;;  %v2023_v50 = vsel %vm2022_vm3, 0.0, %v2017_v48  ;;  %v2006_v53 = vadd.f32 %v2002_v47, %v1979_v49 }
 0xded   : > { %v2027_v20 = vrot.slane %v2023_v50, 4 }
 0xdef   : > { %v2029_v55 = vsel %vm749_vm8, %v2027_v20, %v2028_v40  ;;  %v2032_v57 = vadd.f32 %v2027_v20, %v2005_v51 }
 0xdf0   : > { %v2033_v58 = vadd.f32 %v2029_v55, %v2006_v53 }
 0xdf1   : > { %v2034_v6 = vmax.f32 %v2032_v57, 0.0 }
 0xdf2   : > { %v2035_v22 = vmax.f32 %v2033_v58, 0.0 }
 0xdf3   : > { %v2040_v59 = vrot.slane %v2034_v6, 4 }
 0xdf4   : > { %v2041_v61 = vrot.slane %v2035_v22, 4  ;;  %v3563_v63 = vpack.i.bf16 %v2035_v22, %v2034_v6 }
 0xdf6   : > { %3564 = vrot.lane.b32.xlu1 %v3563_v63, %s4659_s23  ;;  %v2042_v2 = vsel %vm749_vm8, %v2040_v59, %v2041_v61 }
 0xdf7   : > { %v3568_v5 = vpack.i.bf16 %v2041_v61, %v2042_v2  ;;  %v3578_v7 = vpack.i.bf16 %v2042_v2, %v2041_v61 }
 0xdf9   : > { %3569 = vrot.lane.b32.xlu0 %v3568_v5, %s4662_s3 }
 0xdfa   : > { %3574 = vrot.lane.b32.xlu1 %v3563_v63, %s4674_s9 }
 0xdfd   : > { %3579 = vrot.lane.b32.xlu0 %v3578_v7, %s4675_s13 }
 0xdfe   : > { %3584 = vrot.lane.b32.xlu1 %v3563_v63, %s4663_s21 }
 0xe01   : > { %3589 = vrot.lane.b32.xlu0 %v3568_v5, %s4655_s20 }
 0xe02   : > { %3594 = vrot.lane.b32.xlu1 %v3563_v63, %s4676_s14 }
 0xe05   : > { %3599 = vrot.lane.b32.xlu0 %v3568_v5, %s4677_s28  ;;  %s4682_s28 = smov 90  }
 0xe06   : > { %2098 = vperm.xlu1 %3467, %v2037_v9  }
 0xe09   : > { %2207 = vrot.lane.b32.xlu0 %v4279_v8, %s4675_s13  ;;  %v2183_v8 = vld [vmem:[%s4590_s16 + $0x38] sm:$0xff]  ;;  %s4681_s13 = smov 91  }
 0xe0a   : > { %v3321_v19 = vpack.c.bf16 %v2186_v17, %v2183_v8  ;;  %v2036_v8 = vld [vmem:[%s4579_s5] sm:$0xff]  ;;  %v3341_v17 = vpack.c.bf16 %v2187_v16, %v2184_v13 }
 0xe0c   : > { %3322 = vmatprep.subr.bf16.mxu1 %v3321_v19  ;;  %v2193_v19 = vld [vmem:[%s4590_s16 + $0x88] sm:$0xff] }
 0xe0d   : > { %3324 = vmatpush1.bf16.msra.mxu1 %v3323_v3  ;;  %v3345_v62 = vpack.c.bf16 %v2193_v19, %v2190_v0  ;;  %v2199_v3 = vld [vmem:[%s4590_s16 + $0xb8] sm:$0xff] }
 0xe0e   : > { %3326 = vmatprep.subr.bf16.mxu1 %v3325_v25  ;;  %v3349_v23 = vpack.c.bf16 %v2199_v3, %v2196_v21  ;;  %v2202_v25 = vld [vmem:[%s4590_s16 + $0xd0] sm:$0xff]  ;;  %v2450_v3 = vld [vmem:[%s4586_s12] sm:$0x7] }
 0xe11   : > { %3328 = vmatpush1.bf16.msra.mxu1 %v3327_v11  ;;  %v2205_v11 = vld [vmem:[%s4590_s16 + $0xe8] sm:$0xff] }
 0xe12   : > { %3330 = vmatprep.subr.bf16.mxu1 %v3329_v27  ;;  %v3353_v18 = vpack.c.bf16 %v2205_v11, %v2202_v25 }
 0xe15   : > { %3332 = vmatpush1.bf16.msra.mxu1 %v3331_v28 }
 0xe16   : > { %3334 = vmatprep.subr.bf16.mxu1 %v3333_v32 }
 0xe19   : > { %3336 = vmatpush1.bf16.msra.mxu1 %v3335_v52 }
 0xe68   : > { %v3565_v33 = vpop.permute.xlu1 %3564 }
 0xe69   : > { %v3566_v34 = vunpack.i.l.bf16 %v3565_v33  ;;  %v3567_v45 = vunpack.i.h.bf16 %v3565_v33 }
 0xe6b   : > { %v2092_v35 = vsel %vm749_vm8, %v2041_v61, %v3566_v34  ;;  %v3570_v37 = vpop.permute.xlu0 %3569 }
 0xe6c   : > { %v3296_v38 = vpack.c.bf16 %v2092_v35, %v2042_v2  ;;  %v3571_v39 = vunpack.i.l.bf16 %v3570_v37  ;;  %v3575_v41 = vpop.permute.xlu1 %3574  ;;  %v3572_v42 = vunpack.i.h.bf16 %v3570_v37 }
 0xe6d   : > { %v3576_v44 = vunpack.i.l.bf16 %v3575_v41  ;;  %v3577_v46 = vunpack.i.h.bf16 %v3575_v41 }
 0xe6e   : > { %3297 = vmatpush3.bf16.msra.mxu0 %v3296_v38  ;;  %v3299_v1 = vpack.c.bf16 %v3571_v39, %v3567_v45 }
 0xe6f   : > { %v3580_v43 = vpop.permute.xlu0 %3579  ;;  %3298 = vmatprep.subr.bf16.mxu0 %v3660_v36  ;;  %v2093_v10 = vsel %vm749_vm8, %v3572_v42, %v3576_v44 }
 0xe70   : > { %v3585_v47 = vpop.permute.xlu1 %3584  ;;  %v3581_v48 = vunpack.i.l.bf16 %v3580_v43  ;;  %v3302_v40 = vpack.c.bf16 %v3577_v46, %v2093_v10  ;;  %v3582_v20 = vunpack.i.h.bf16 %v3580_v43 }
 0xe71   : > { %v3586_v49 = vunpack.i.l.bf16 %v3585_v47  ;;  %v3587_v22 = vunpack.i.h.bf16 %v3585_v47 }
 0xe72   : > { %3300 = vmatpush3.bf16.msra.mxu0 %v3299_v1 }
 0xe73   : > { %3301 = vmatprep.subr.bf16.mxu0 %v3660_v36  ;;  %v2094_v50 = vsel %vm749_vm8, %v3581_v48, %v3586_v49  ;;  %v3590_v51 = vpop.permute.xlu0 %3589 }
 0xe74   : > { %v3595_v53 = vpop.permute.xlu1 %3594  ;;  %v3305_v55 = vpack.c.bf16 %v2094_v50, %v3582_v20  ;;  %v3591_v57 = vunpack.i.l.bf16 %v3590_v51  ;;  %v3592_v58 = vunpack.i.h.bf16 %v3590_v51 }
 0xe75   : > { %v3596_v6 = vunpack.i.l.bf16 %v3595_v53  ;;  %v3597_v61 = vunpack.i.h.bf16 %v3595_v53 }
 0xe76   : > { %3303 = vmatpush3.bf16.msra.mxu0 %v3302_v40  ;;  %v3308_v59 = vpack.c.bf16 %v3591_v57, %v3587_v22 }
 0xe77   : > { %3304 = vmatprep.subr.bf16.mxu0 %v3660_v36  ;;  %v2095_v63 = vsel %vm749_vm8, %v3592_v58, %v3596_v6  ;;  %v3600_v2 = vpop.permute.xlu0 %3599  ;;  %vm2209_vm8 = vcmask 654336  }
 0xe78   : > { %v3311_v5 = vpack.c.bf16 %v3597_v61, %v2095_v63  ;;  %v3602_v7 = vunpack.i.h.bf16 %v3600_v2  ;;  %v3601_v9 = vunpack.i.l.bf16 %v3600_v2 }
 0xe7a   : > { %3306 = vmatpush3.bf16.msra.mxu0 %v3305_v55  ;;  %v3314_v56 = vpack.c.bf16 %v3602_v7, %v3601_v9 }
 0xe7b   : > { %3307 = vmatprep.subr.bf16.mxu0 %v3660_v36  ;;  %v2208_v28 = vpop.permute.xlu0 %2207 }
 0xe7e   : > { %3309 = vmatpush3.bf16.msra.mxu0 %v3308_v59 }
 0xe7f   : > { %3310 = vmatprep.subr.bf16.mxu0 %v3660_v36 }
 0xe82   : > { %3312 = vmatpush3.bf16.msra.mxu0 %v3311_v5 }
 0xe83   : > { %3313 = vmatprep.subr.bf16.mxu0 %v3660_v36 }
 0xe85   : > { %v2099_v14 = vpop.permute.xlu1 %2098 }
 0xe86   : > { %3316 = vmatpush3.bf16.msk.msra.mxu0 %vm4261_vm11, %v3314_v56 }
 0xe87   : > { %3338 = vmatprep.subr.bf16.mxu0 %v3337_v54 }
 0xe89   : > { %3105 = vmatmul.mubr.msk.f32.vlgmr.msra.gmra.mrb[12].mxu0 %vm692_vm5, %v2036_v8 }
 0xe8a   : > { %3340 = vmatpush3.bf16.msra.mxu0 %v3337_v54 }
 0xe8b   : > { %3342 = vmatprep.subr.bf16.mxu0 %v3341_v17 }
 0xe8e   : > { %3344 = vmatpush3.bf16.msra.mxu0 %v3341_v17 }
 0xe8f   : > { %3346 = vmatprep.subr.bf16.mxu0 %v3345_v62 }
 0xe92   : > { %3348 = vmatpush3.bf16.msra.mxu0 %v3345_v62 }
 0xe93   : > { %3350 = vmatprep.subr.bf16.mxu0 %v3349_v23 }
 0xe96   : > { %3352 = vmatpush3.bf16.msra.mxu0 %v3349_v23 }
 0xe97   : > { %3354 = vmatprep.subr.bf16.mxu0 %v3353_v18 }
 0xe9a   : > { %3356 = vmatpush3.bf16.msra.mxu0 %v3353_v18 }
 0xe9b   : > { %3373 = vmatprep.subr.bf16.mxu0 %v3660_v36 }
 0xf5c   : > { %v2172_v26 = vpop.f32.mrb[12].mxu0 }
 0xf5d   : > { %v2173_v27 = vadd.f32 %v2172_v26, %v2099_v14  ;;  %v3106_v15 = vpop.f32.mrb[13].mxu0 }
 0xf5f   : > { %2826 = vmatmul.mubr.msk.f32.vlgmr.msra.gmra.mrb[18].mxu1 %vm2209_vm8, %v2173_v27  ;;  %3127 = vmatprep.mubr.msk.f32.mxu0 %vm2209_vm8, %v2173_v27 }
 0xf60   : > { %3128 = vmatmul.mubr.msk.f32.vlgmr.msra.gmra.mrb[14].mxu0 %vm2209_vm8, %v2208_v28  ;;  %2285 = vmatprep.mubr.f32.mxu1 %v3655_v30 }
 0xf61   : > { %3148 = vmatprep.mubr.msk.f32.mxu0 %vm3661_vm6, %v3655_v30 }
 0xf63   : > { %2827 = vmatmul.mubr.msk.f32.gmra.mrb[20].mxu1 %vm2209_vm8, %v2208_v28 }
 0xf64   : > { %2614 = vmatprep.mubr.f32.mxu1 %v3655_v30 }
0x1032   : > { %v2281_v60 = vpop.f32.mrb[18].mxu1 }
0x1033   : > { %v2283_v31 = vpop.f32.mrb[19].mxu1  ;;  %v3129_v32 = vpop.f32.mrb[14].mxu0 }
0x1034   : > { %v2358_v33 = vpop.f32.mrb[15].mxu0  ;;  %vm2399_vm11 = vcmp.eq.f32.partialorder %v3129_v32, 2.0  ;;  %vm2375_vm15 = vcmp.eq.f32.partialorder %v3129_v32, 1.0  ;;  %vm2423_vm12 = vcmp.eq.f32.partialorder %v3129_v32, 3.0  ;;  %vm2369_vm13 = vcmp.eq.f32.partialorder %v3129_v32, 0.0 }
0x1035   : > { %v2402_v34 = vsel %vm2399_vm11, %v2358_v33, 0.0  ;;  %v2378_v35 = vsel %vm2375_vm15, %v2358_v33, 0.0  ;;  %v2426_v37 = vsel %vm2423_vm12, %v2358_v33, 0.0  ;;  %v2372_v38 = vsel %vm2369_vm13, %v2358_v33, 0.0 }
0x1036   : > { %2410 = vrot.lane.b32.xlu0 %v2402_v34, %s4660_s24  ;;  %2386 = vrot.lane.b32.xlu1 %v2378_v35, %s4658_s22  ;;  %v2287_v39 = vpop.f32.mrb[20].mxu1  ;;  %vm2436_vm15 = vcmask 154624   ;;  %vm4687_vm12 = vcmask 744448  }
0x1037   : > { %v2289_v41 = vpop.f32.mrb[21].mxu1  ;;  %vm2397_vm6 = vcmp.eq.f32.partialorder %v2287_v39, 2.0  ;;  %vm2373_vm14 = vcmp.eq.f32.partialorder %v2287_v39, 1.0  ;;  %vm2421_vm7 = vcmp.eq.f32.partialorder %v2287_v39, 3.0  ;;  %vm2367_vm10 = vcmp.eq.f32.partialorder %v2287_v39, 0.0  ;;  %vm4688_vm13 = vmmov %vm4687_vm12 }
0x1038   : > { %v2400_v42 = vsel %vm2397_vm6, %v2281_v60, 0.0  ;;  %v2376_v44 = vsel %vm2373_vm14, %v2281_v60, 0.0  ;;  %v2424_v45 = vsel %vm2421_vm7, %v2281_v60, 0.0  ;;  %vm2374_vm0 = vcmp.eq.f32.partialorder %v2289_v41, 1.0 }
0x1039   : > { %v2377_v43 = vsel %vm2374_vm0, %v2283_v31, 0.0  ;;  %vm2398_vm3 = vcmp.eq.f32.partialorder %v2289_v41, 2.0  ;;  %vm2422_vm8 = vcmp.eq.f32.partialorder %v2289_v41, 3.0  ;;  %v2370_v1 = vsel %vm2367_vm10, %v2281_v60, 0.0 }
0x103a   : > { %2406 = vrot.lane.b32.xlu0 %v2400_v42, %s4660_s24  ;;  %2382 = vrot.lane.b32.xlu1 %v2376_v44, %s4658_s22  ;;  %v2401_v46 = vsel %vm2398_vm3, %v2283_v31, 0.0  ;;  %v2425_v47 = vsel %vm2422_vm8, %v2283_v31, 0.0  ;;  %vm2368_vm11 = vcmp.eq.f32.partialorder %v2289_v41, 0.0  ;;  %vm4689_vm6 = vcmask 752640  }
0x103b   : > { %v2371_v10 = vsel %vm2368_vm11, %v2283_v31, 0.0  ;;  %vm4690_vm14 = vmmov %vm4689_vm6  ;;  %vm4693_vm10 = vcmask 588800   ;;  %vm2696_vm3 = vcmask 256000  }
0x103c   : > { %vm4694_vm0 = vmmov %vm4693_vm10 }
0x103e   : > { %2430 = vrot.lane.b32.xlu1 %v2424_v45, %s3680_s26  ;;  %2384 = vrot.lane.b32.xlu0 %v2377_v43, %s4658_s22  ;;  %s4678_s22 = smov 110  }
0x1042   : > { %2408 = vrot.lane.b32.xlu1 %v2401_v46, %s4660_s24  ;;  %2432 = vrot.lane.b32.xlu0 %v2425_v47, %s3680_s26  ;;  %s4679_s24 = smov 109  }
0x1046   : > { %2434 = vrot.lane.b32.xlu1 %v2426_v37, %s3680_s26 }
0x10a8   : > { %v2411_v48 = vpop.permute.xlu0 %2410  ;;  %v2387_v49 = vpop.permute.xlu1 %2386 }
0x10ac   : > { %v2407_v40 = vpop.permute.xlu0 %2406  ;;  %v2383_v50 = vpop.permute.xlu1 %2382 }
0x10ad   : > { %v2393_v51 = vsel %vm1016_vm4, 0.0, %v2383_v50  ;;  %v2417_v53 = vsel %vm998_vm9, 0.0, %v2407_v40 }
0x10ae   : > { %v2394_v20 = vadd.f32 %v2393_v51, %v2370_v1 }
0x10b0   : > { %v2431_v55 = vpop.permute.xlu1 %2430  ;;  %v2418_v57 = vadd.f32 %v2417_v53, %v2394_v20  ;;  %v2385_v58 = vpop.permute.xlu0 %2384 }
0x10b1   : > { %v2442_v6 = vsel %vm2436_vm15, 0.0, %v2431_v55  ;;  %v2388_v22 = vsel %vm1016_vm4, %v2383_v50, %v2385_v58  ;;  %v2389_v61 = vsel %vm1016_vm4, %v2385_v58, %v2387_v49 }
0x10b2   : > { %v2443_v59 = vadd.f32 %v2442_v6, %v2418_v57  ;;  %v2395_v2 = vadd.f32 %v2388_v22, %v2371_v10  ;;  %v2396_v4 = vadd.f32 %v2389_v61, %v2372_v38 }
0x10b4   : > { %v4506_v63 = vmax.f32 %v2443_v59, 0.0  ;;  %v2409_v5 = vpop.permute.xlu1 %2408  ;;  %v2433_v54 = vpop.permute.xlu0 %2432 }
0x10b5   : > { %v2412_v7 = vsel %vm998_vm9, %v2407_v40, %v2409_v5  ;;  %v2413_v9 = vsel %vm998_vm9, %v2409_v5, %v2411_v48  ;;  %v2437_v16 = vsel %vm2436_vm15, %v2431_v55, %v2433_v54  ;;  %vm4683_vm9 = vcmask 1031168  }
0x10b6   : > { %v2419_v12 = vadd.f32 %v2412_v7, %v2395_v2  ;;  %2454 = vrot.lane.b32.xlu1 %v4506_v63, %s4659_s23  ;;  %2465 = vrot.lane.b32.xlu0 %v4506_v63, %s4662_s3  ;;  %v2420_v56 = vadd.f32 %v2413_v9, %v2396_v4 }
0x10b8   : > { %v2435_v13 = vpop.permute.xlu1 %2434  ;;  %v2444_v17 = vadd.f32 %v2437_v16, %v2419_v12 }
0x10b9   : > { %v2438_v8 = vsel %vm2436_vm15, %v2433_v54, %v2435_v13 }
0x10ba   : > { %v2445_v0 = vadd.f32 %v2438_v8, %v2420_v56  ;;  %2476 = vrot.lane.b32.xlu1 %v4506_v63, %s4678_s22  ;;  %2487 = vrot.lane.b32.xlu0 %v4506_v63, %s4679_s24  ;;  %v2447_v62 = vmax.f32 %v2444_v17, 0.0  ;;  %v2449_v17 = vld [vmem:[%s4580_s6] sm:$0x7] }
0x10bc   : > { %v2448_v19 = vmax.f32 %v2445_v0, 0.0 }
0x10be   : > { %2498 = vrot.lane.b32.xlu1 %v4506_v63, %s4655_s20  ;;  %2509 = vrot.lane.b32.xlu0 %v4506_v63, %s4680_s1  ;;  %v3613_v21 = vpack.i.bf16 %v2448_v19, %v2447_v62 }
0x10c2   : > { %3614 = vrot.lane.b32.xlu1 %v3613_v21, %s4678_s22  ;;  %3604 = vrot.lane.b32.xlu0 %v3613_v21, %s4659_s23 }
0x10c6   : > { %3624 = vrot.lane.b32.xlu1 %v3613_v21, %s4655_s20  ;;  %3609 = vrot.lane.b32.xlu0 %v3613_v21, %s4662_s3  ;;  %s4695_s3 = smul.u32 12, %s4697_s30 }
0x10c8   : > { %s610_s8 = scalar_lea.vmem %s4592_s18, %s4695_s3 }
0x10ca   : > { %3634 = vrot.lane.b32.xlu1 %v3613_v21, %s4681_s13  ;;  %3619 = vrot.lane.b32.xlu0 %v3613_v21, %s4679_s24 }
0x10ce   : > { %2520 = vrot.lane.b32.xlu1 %v4506_v63, %s4681_s13  ;;  %3629 = vrot.lane.b32.xlu0 %v3613_v21, %s4680_s1 }
0x10d2   : > { %2535 = vrot.lane.b32.xlu1 %v2448_v19, %s4682_s28  ;;  %2533 = vrot.lane.b32.xlu0 %v2447_v62, %s4682_s28 }
0x10d6   : > { %2544 = vperm.xlu1 %3467, %v2450_v3   ;;  %2531 = vrot.lane.b32.xlu0 %v4506_v63, %s4682_s28 }
0x1128   : > { %v2455_v23 = vpop.permute.xlu1 %2454  ;;  %v2466_v29 = vpop.permute.xlu0 %2465 }
0x112c   : > { %v2477_v24 = vpop.permute.xlu1 %2476  ;;  %v2488_v25 = vpop.permute.xlu0 %2487 }
0x1130   : > { %v2499_v52 = vpop.permute.xlu1 %2498  ;;  %v2510_v11 = vpop.permute.xlu0 %2509 }
0x1134   : > { %v3615_v18 = vpop.permute.xlu1 %3614  ;;  %v3605_v14 = vpop.permute.xlu0 %3604 }
0x1135   : > { %v3607_v26 = vunpack.i.h.bf16 %v3605_v14  ;;  %v3606_v27 = vunpack.i.l.bf16 %v3605_v14  ;;  %v3617_v15 = vunpack.i.h.bf16 %v3615_v18  ;;  %v3616_v28 = vunpack.i.l.bf16 %v3615_v18 }
0x1137   : > { %v3374_v60 = vpack.c.bf16 %v3607_v26, %v2448_v19  ;;  %v2460_v31 = vsel %vm633_vm2, %v2455_v23, %v3606_v27  ;;  %v2461_v32 = vsel %vm633_vm2, %v3606_v27, %v3607_v26  ;;  %v2482_v41 = vsel %vm663_vm1, %v2477_v24, %v3616_v28  ;;  %vm4684_vm2 = vmmov %vm4683_vm9 }
0x1138   : > { %v3359_v33 = vpack.c.bf16 %v2460_v31, %v4506_v63  ;;  %v3625_v34 = vpop.permute.xlu1 %3624  ;;  %v3610_v35 = vpop.permute.xlu0 %3609  ;;  %v3357_v37 = vpack.c.bf16 %v2461_v32, %v2447_v62  ;;  %v2483_v44 = vsel %vm663_vm1, %v3616_v28, %v3617_v15  ;;  %vm4685_vm1 = vcmask 891904  }
0x1139   : > { %v3612_v38 = vunpack.i.h.bf16 %v3610_v35  ;;  %v3611_v39 = vunpack.i.l.bf16 %v3610_v35  ;;  %3375 = vmatpush3.bf16.msra.mxu0 %v3374_v60  ;;  %v3626_v42 = vunpack.i.l.bf16 %v3625_v34  ;;  %v3627_v45 = vunpack.i.h.bf16 %v3625_v34  ;;  %vm4686_vm4 = vmmov %vm4685_vm1 }
0x113a   : > { %3358 = vmatprep.subr.bf16.mxu1 %v3357_v37  ;;  %3376 = vmatprep.subr.bf16.mxu0 %v3660_v36 }
0x113b   : > { %v3377_v43 = vpack.c.bf16 %v3617_v15, %v3612_v38  ;;  %v2471_v1 = vsel %vm4683_vm9, %v2466_v29, %v3611_v39  ;;  %3360 = vmatpush1.bf16.msra.mxu1 %v3359_v33  ;;  %v2472_v46 = vsel %vm4684_vm2, %v3611_v39, %v3612_v38  ;;  %v2504_v51 = vsel %vm692_vm5, %v2499_v52, %v3626_v42 }
0x113c   : > { %v3363_v47 = vpack.c.bf16 %v2482_v41, %v2471_v1  ;;  %v3635_v10 = vpop.permute.xlu1 %3634  ;;  %v3620_v48 = vpop.permute.xlu0 %3619  ;;  %v3361_v49 = vpack.c.bf16 %v2483_v44, %v2472_v46  ;;  %v2505_v6 = vsel %vm692_vm5, %v3626_v42, %v3627_v45  ;;  %vm4691_vm5 = vcmask 736256  }
0x113d   : > { %v3622_v40 = vunpack.i.h.bf16 %v3620_v48  ;;  %v3621_v50 = vunpack.i.l.bf16 %v3620_v48  ;;  %3378 = vmatpush3.bf16.msra.mxu0 %v3377_v43  ;;  %v3637_v20 = vunpack.i.h.bf16 %v3635_v10  ;;  %v3636_v53 = vunpack.i.l.bf16 %v3635_v10  ;;  %vm4692_vm7 = vmmov %vm4691_vm5 }
0x113e   : > { %3362 = vmatprep.subr.bf16.mxu1 %v3361_v49  ;;  %3379 = vmatprep.subr.bf16.mxu0 %v3660_v36 }
0x113f   : > { %v3380_v55 = vpack.c.bf16 %v3627_v45, %v3622_v40  ;;  %v2493_v57 = vsel %vm4685_vm1, %v2488_v25, %v3621_v50  ;;  %3364 = vmatpush1.bf16.msra.mxu1 %v3363_v47  ;;  %v2494_v58 = vsel %vm4686_vm4, %v3621_v50, %v3622_v40  ;;  %v2527_v7 = vsel %vm4687_vm12, %v3636_v53, %v3637_v20 }
0x1140   : > { %v3367_v22 = vpack.c.bf16 %v2504_v51, %v2493_v57  ;;  %v2521_v59 = vpop.permute.xlu1 %2520  ;;  %v3630_v61 = vpop.permute.xlu0 %3629  ;;  %v3365_v63 = vpack.c.bf16 %v2505_v6, %v2494_v58 }
0x1141   : > { %v3632_v2 = vunpack.i.h.bf16 %v3630_v61  ;;  %v3631_v5 = vunpack.i.l.bf16 %v3630_v61  ;;  %3381 = vmatpush3.bf16.msra.mxu0 %v3380_v55  ;;  %v2526_v9 = vsel %vm4688_vm13, %v2521_v59, %v3636_v53 }
0x1142   : > { %3366 = vmatprep.subr.bf16.mxu1 %v3365_v63  ;;  %3382 = vmatprep.subr.bf16.mxu0 %v3660_v36 }
0x1143   : > { %v3383_v4 = vpack.c.bf16 %v3637_v20, %v3632_v2  ;;  %v2515_v12 = vsel %vm4689_vm6, %v2510_v11, %v3631_v5  ;;  %3368 = vmatpush1.bf16.msra.mxu1 %v3367_v22  ;;  %v2516_v54 = vsel %vm4690_vm14, %v3631_v5, %v3632_v2 }
0x1144   : > { %v3371_v56 = vpack.c.bf16 %v2526_v9, %v2515_v12  ;;  %v2536_v13 = vpop.permute.xlu1 %2535  ;;  %v2534_v16 = vpop.permute.xlu0 %2533  ;;  %v3369_v8 = vpack.c.bf16 %v2527_v7, %v2516_v54 }
0x1145   : > { %3384 = vmatpush3.bf16.msra.mxu0 %v3383_v4  ;;  %v2538_v36 = vsel %vm4691_vm5, %v2534_v16, %v2536_v13 }
0x1146   : > { %3370 = vmatprep.subr.bf16.mxu1 %v3369_v8  ;;  %3146 = vmatprep.subr.mxu0 %v3655_v30 }
0x1147   : > { %3372 = vmatpush1.bf16.msra.mxu1 %v3371_v56 }
0x1148   : > { %v2532_v0 = vpop.permute.xlu0 %2531  ;;  %2566 = vmatprep.subr.mxu1 %v2538_v36 }
0x1149   : > { %v2537_v19 = vsel %vm4692_vm7, %v2532_v0, %v2534_v16  ;;  %3147 = vmatpush3.msra.mxu0 %v2536_v13 }
0x114a   : > { %3149 = vmatmul.mubr.msk.f32.vlgmr.msra.gmra.mrb[16].mxu0 %vm4693_vm10, %v2449_v17 }
0x114b   : > { %2567 = vmatpush1.msra.mxu1 %v2537_v19 }
0x114c   : > { %2830 = vmatmul.mubr.msk.f32.vlgmr.msra.gmra.mrb[22].mxu1 %vm4694_vm0, %v2449_v17 }
0x1155   : > { %v2545_v62 = vpop.permute.xlu1 %2544 }
0x121d   : > { %v2687_v30 = vpop.f32.mrb[16].mxu0 }
0x121e   : > { %v2688_v21 = vadd.f32 %v2687_v30, %v2545_v62  ;;  %v3150_v3 = vpop.f32.mrb[17].mxu0 }
0x121f   : > { %v2616_v23 = vpop.f32.mrb[22].mxu1 }
0x1220   : > { %2697 = vst.msk [vmem:[%s610_s8 + $0x8] sm:$0x7] %vm2696_vm3, %v2688_v21  ;;  %v2617_v29 = vadd.f32 %v2616_v23, %v2545_v62  ;;  %v2618_v24 = vpop.f32.mrb[23].mxu1 }
0x1221   : > { %v2619_v25 = vadd.f32 %v2618_v24, %v2545_v62 }
0x1223   : > { %v2693_v52 = vcombine.low %v2617_v29, %v2619_v25 }
0x1225   : > { %2695 = vst [vmem:[%s610_s8] sm:$0x77] %v2693_v52 }
0x1226 PF: > { %s30_s0 = sadd.s32 1, %s3647_s0  }
0x1227   : > { %p27_p4 = scmp.ge.s32.totalorder %s30_s0, 4  }
0x1229   :  { %29 = sbr.rel (!%p27_p4) target bundleno = 10 (0xa), region = 134 }

</bundles_post_ra>
